<compile_context>
chip_gen: v7x
topology: tpu7x:2x2x1
jax: 0.10.0
libtpu: 0.0.40
codegen_flags: <defaults>
</compile_context>

<pallas_src>
import numpy as np
import jax
import jax.numpy as jnp
from jax.experimental import pallas as pl
from jax.experimental.pallas import tpu as pltpu

# torch-ngp fast_hash primes (7 dims), reinterpreted as wrapped int32 so int32
# multiplies in the kernel are bit-identical to uint32 multiplies.
_PRIMES_U32 = np.array([1, 2654435761, 805459861, 3674653429, 2097192037,
                        1434869437, 2165219737], dtype=np.uint32)
_PRIMES_I32 = [int(p) for p in _PRIMES_U32.view(np.int32)]


def _grid_encode_kernel(res_ref, mask_ref, dense_ref, coords_ref, table_ref, out_ref):
    """One (level, point-tile) step.

    res_ref/mask_ref/dense_ref : (L,) int32 scalar-prefetch (SMEM)
    coords_ref                 : (D, TILE_N) f32, lane-dense points
    table_ref                  : (1, F, T_max) f32, this level's table, transposed
    out_ref                    : (1, F, TILE_N) f32, lane-dense output
    """
    level = pl.program_id(0)
    R = res_ref[level]                    # int32 resolution of this level
    hmask = mask_ref[level]               # int32 size-1 (power-of-two size on hashed levels)
    is_dense = dense_ref[level] != 0      # dense grid vs hashed level

    coords = coords_ref[...]              # (D, TILE_N) f32 in [0, 1)
    table_t = table_ref[0]                # (F, T_max) f32, cols >= H are zero pad
    num_dim, tile_n = coords.shape
    t_max = table_t.shape[1]

    # align_corners-style grid: `resolution` vertices per dim (matches
    # params_in_level = resolution**num_dim in the PyTorch module).
    scale = (R - 1).astype(jnp.float32)
    pos = coords * scale                  # (D, N)
    pos_floor = jnp.floor(pos)
    frac = pos - pos_floor                # (D, N)
    base = pos_floor.astype(jnp.int32)    # (D, N)

    # Per-dim / per-bit corner terms, hoisted out of the 2**D corner loop:
    #   bit=0 / bit=1 grid coord, its dense-stride product, its hash product,
    #   and the 1-D interpolation weight.
    w1 = frac
    w0 = 1.0 - frac
    dense_c = [[None, None] for _ in range(num_dim)]
    hash_c = [[None, None] for _ in range(num_dim)]
    weight_c = [[None, None] for _ in range(num_dim)]
    stride = jnp.int32(1)                 # dynamic dense strides [1, R, R^2, ...]
    for d in range(num_dim):
        g0 = base[d:d + 1, :]             # (1, N)
        g1 = g0 + 1
        dense_c[d][0] = g0 * stride
        dense_c[d][1] = g1 * stride
        prime = jnp.int32(_PRIMES_I32[d])
        hash_c[d][0] = g0 * prime
        hash_c[d][1] = g1 * prime
        weight_c[d][0] = w0[d:d + 1, :]
        weight_c[d][1] = w1[d:d + 1, :]
        stride = stride * R

    # Fused corner accumulation: wmat[t, n] = sum_c w_c[n] * (idx_c[n] == t),
    # built on the VPU, then a single MXU contraction per (level, tile).
    iota_t = jax.lax.broadcasted_iota(jnp.int32, (t_max, tile_n), 0)
    wmat = jnp.zeros((t_max, tile_n), jnp.float32)

    for corner in range(2 ** num_dim):
        bit0 = corner & 1
        w = weight_c[0][bit0]
        dense_idx = dense_c[0][bit0]
        hash_val = hash_c[0][bit0]
        for d in range(1, num_dim):
            bit = (corner >> d) & 1
            w = w * weight_c[d][bit]
            dense_idx = dense_idx + dense_c[d][bit]
            hash_val = jnp.bitwise_xor(hash_val, hash_c[d][bit])

        # hashed: size is 2**log2_hashmap_size, so `& (size-1)` == uint32 `% size`.
        # dense: index is provably in-range (inputs clamped to [0, 1)), no modulo.
        idx = jnp.where(is_dense, dense_idx, jnp.bitwise_and(hash_val, hmask))
        wmat = wmat + jnp.where(iota_t == idx, w, 0.0)

    # Single (F, T) @ (T, N) matmul -> lane-dense (F, N). The weight matrix holds
    # real-valued interpolation weights (not 0/1), so keep f32 HIGHEST for
    # accuracy; the MXU is far from the bottleneck here (the VPU one-hot
    # accumulation dominates), so HIGHEST is effectively free.
    out_ref[0] = jnp.dot(table_t, wmat,
                         preferred_element_type=jnp.float32,
                         precision=jax.lax.Precision.HIGHEST)


class GridEncoder:
    def __init__(self, num_dim=3, n_features=2,
                 resolutions_list=(4, 6, 8, 12), log2_hashmap_size=7,
                 ste_binary=False, ste_multistep=False, add_noise=False, Q=1,
                 key=None):
        self.num_dim = num_dim
        self.n_features = n_features
        self.resolutions_list = np.asarray(resolutions_list, dtype=np.int32)
        self.n_levels = len(resolutions_list)
        self.log2_hashmap_size = log2_hashmap_size
        self.max_params = 2 ** log2_hashmap_size
        self.ste_binary = ste_binary
        self.ste_multistep = ste_multistep
        self.add_noise = add_noise
        self.Q = Q

        offsets = []
        offset = 0
        for r in self.resolutions_list:
            p = min(self.max_params, int(r) ** num_dim)
            p = int(np.ceil(p / 8) * 8)
            offsets.append(offset)
            offset += p
        offsets.append(offset)
        self.offsets_list = np.asarray(offsets, dtype=np.int64)
        self.sizes = (self.offsets_list[1:] - self.offsets_list[:-1]).astype(np.int32)
        self.is_dense = np.asarray(
            [1 if int(r) ** num_dim <= int(h) else 0
             for r, h in zip(self.resolutions_list, self.sizes)], dtype=np.int32)
        # Hashed levels have size exactly 2**log2_hashmap_size (a power of two),
        # so (size - 1) is a valid AND-mask; the value is unused on dense levels.
        self.hash_mask = (self.sizes - 1).astype(np.int32)
        self.output_dim = self.n_levels * n_features

        # Pad the per-level row count up to a lane multiple so the matmul's
        # contraction dim is 128-aligned for the MXU.
        self.t_max = int(np.ceil(int(self.sizes.max()) / 128) * 128)

        if key is None:
            key = jax.random.PRNGKey(0)
        std = 1e-4  # reset_parameters(): uniform_(-1e-4, 1e-4)
        self.params = jax.random.uniform(key, (offset, n_features),
                                         minval=-std, maxval=std,
                                         dtype=jnp.float32)

        # Stack / pad / transpose per-level tables ONCE at init (hoisted out of
        # the forward): (L, F, T_max), lane-dense along the table rows.
        # TODO(synk): for large log2_hashmap_size, keep the flat (sum_H, F)
        # params in HBM (memory_space=pl.ANY + manual DMA, or scalar-prefetched
        # offsets) instead of zero-padding every level to T_max.
        self.tables_t = self._build_tables()

        # Scalar-prefetch arrays, built once.
        self._res_i32 = jnp.asarray(self.resolutions_list, jnp.int32)
        self._mask_i32 = jnp.asarray(self.hash_mask, jnp.int32)
        self._dense_i32 = jnp.asarray(self.is_dense, jnp.int32)

    def _embeddings(self, test_phase=True):
        p = self.params
        if self.ste_binary:
            return jnp.where(p >= 0, 1.0, -1.0).astype(jnp.float32)
        # TODO(synk): training-time add_noise needs a fresh RNG key per call; skipped.
        if self.ste_multistep or (self.add_noise and test_phase):
            return jnp.round(p * self.Q) / self.Q
        return p

    def _build_tables(self):
        emb = self._embeddings(test_phase=True)
        tables_t = jnp.zeros((self.n_levels, self.n_features, self.t_max),
                             jnp.float32)
        for lvl in range(self.n_levels):
            o0 = int(self.offsets_list[lvl])
            sz = int(self.sizes[lvl])
            tables_t = tables_t.at[lvl, :, :sz].set(emb[o0:o0 + sz].T)
        return tables_t

    def __call__(self, inputs, test_phase=True):
        # TODO(synk): binary_vxl / PV occupancy masking and min/max_level slicing
        #             of the forward are not implemented (defaults used).
        prefix_shape = inputs.shape[:-1]
        x = inputs.reshape(-1, self.num_dim).astype(jnp.float32)
        n_pts = x.shape[0]
        # Clamp to [0, 1) so dense-level corner indices stay in range without a modulo.
        x = jnp.clip(x, 0.0, 1.0 - 2.0 ** -24)

        # Point-tile size: a lane multiple, capped so the (t_max, tile_n) one-hot
        # and iota temporaries stay well inside scoped VMEM on every generation
        # (incl. v7x's 64 MiB physical / 32 MiB scoped default).
        vmem_budget = 8 * 1024 * 1024                       # bytes for the 2 big temps
        cap = max(128, (vmem_budget // (8 * self.t_max)) // 128 * 128)
        n_pad128 = ((n_pts + 127) // 128) * 128
        tile_n = int(min(1024, cap, n_pad128))
        n_tiles = -(-n_pts // tile_n)
        n_pad = n_tiles * tile_n

        # Lane-dense coords: (D, N_pad) with points on the 128-lane axis.
        xt = jnp.zeros((self.num_dim, n_pad), jnp.float32)
        xt = xt.at[:, :n_pts].set(x.T)

        out = pl.pallas_call(
            _grid_encode_kernel,
            out_shape=jax.ShapeDtypeStruct(
                (self.n_levels, self.n_features, n_pad), jnp.float32),
            grid_spec=pltpu.PrefetchScalarGridSpec(
                num_scalar_prefetch=3,
                grid=(self.n_levels, n_tiles),
                in_specs=[
                    pl.BlockSpec((self.num_dim, tile_n),
                                 lambda l, j, *_: (0, j)),
                    pl.BlockSpec((1, self.n_features, self.t_max),
                                 lambda l, j, *_: (l, 0, 0)),
                ],
                out_specs=pl.BlockSpec((1, self.n_features, tile_n),
                                       lambda l, j, *_: (l, 0, j)),
            ),
            compiler_params=pltpu.CompilerParams(
                dimension_semantics=("parallel", "parallel"),
                vmem_limit_bytes=32 * 1024 * 1024),
        )(self._res_i32, self._mask_i32, self._dense_i32, xt, self.tables_t)

        # (L, F, N) -> (N, L, F) -> (N, L*F); matches torch's
        # outputs.permute(1, 0, 2).reshape(N, L*F) on the original (L, N, F).
        out = jnp.transpose(out[:, :, :n_pts], (2, 0, 1)).reshape(
            n_pts, self.output_dim)
        return out.reshape(tuple(prefix_shape) + (self.output_dim,))


def _reference_grid_encode(x, params, offsets, resolutions, num_dim, n_feat):
    """Pure numpy reference (same semantics as the CUDA grid_encode_forward)."""
    n_pts = x.shape[0]
    n_levels = len(resolutions)
    out = np.zeros((n_pts, n_levels, n_feat), np.float32)
    primes = _PRIMES_U32.astype(np.uint64)
    mask32 = np.uint64(0xFFFFFFFF)
    for lvl in range(n_levels):
        R = int(resolutions[lvl])
        o0, o1 = int(offsets[lvl]), int(offsets[lvl + 1])
        H = o1 - o0
        table = params[o0:o1]
        pos = x.astype(np.float32) * np.float32(R - 1)
        base = np.floor(pos).astype(np.int64)
        frac = (pos - np.floor(pos)).astype(np.float32)
        dense = (R ** num_dim) <= H
        acc = np.zeros((n_pts, n_feat), np.float32)
        for corner in range(2 ** num_dim):
            w = np.ones((n_pts,), np.float32)
            g = np.zeros((n_pts, num_dim), np.int64)
            for d in range(num_dim):
                bit = (corner >> d) & 1
                g[:, d] = base[:, d] + bit
                w = w * (frac[:, d] if bit else (np.float32(1.0) - frac[:, d]))
            if dense:
                idx = np.zeros((n_pts,), np.int64)
                stride = 1
                for d in range(num_dim):
                    idx += g[:, d] * stride
                    stride *= R
                idx = idx % H
            else:
                h = np.zeros((n_pts,), np.uint64)
                for d in range(num_dim):
                    h ^= (g[:, d].astype(np.uint64) * primes[d]) & mask32
                idx = ((h & mask32) % np.uint64(H)).astype(np.int64)
            acc += w[:, None] * table[idx]
        out[:, lvl, :] = acc
    return out.reshape(n_pts, n_levels * n_feat)


if __name__ == "__main__":
    key = jax.random.PRNGKey(0)
    k_param, k_in = jax.random.split(key)

    enc = GridEncoder(num_dim=3, n_features=2, resolutions_list=(4, 6, 8, 12),
                      log2_hashmap_size=7, key=k_param)
    # inputs: (..., num_dim) coordinates in [0, 1)
    inputs = jax.random.uniform(k_in, (2, 32, 3), dtype=jnp.float32,
                                minval=0.0, maxval=0.999)

    out = enc(inputs)
    out = jax.block_until_ready(out)

    ref = _reference_grid_encode(np.asarray(inputs).reshape(-1, 3),
                                 np.asarray(enc.params),
                                 enc.offsets_list, enc.resolutions_list,
                                 enc.num_dim, enc.n_features)
    ref = ref.reshape(2, 32, enc.output_dim)

    assert out.shape == (2, 32, enc.output_dim), out.shape
    np.testing.assert_allclose(np.asarray(out), ref, rtol=1e-3, atol=1e-7)
    print("KERNEL_OK")
</pallas_src>

<mosaic_0001>
module attributes {stable_mosaic.version = 11 : i64} {
  func.func @_grid_encode_kernel(%arg0: i32, %arg1: i32, %arg2: memref<4xi32, #tpu.memory_space<smem>>, %arg3: memref<4xi32, #tpu.memory_space<smem>>, %arg4: memref<4xi32, #tpu.memory_space<smem>>, %arg5: memref<3x128xf32, #tpu.memory_space<vmem>>, %arg6: memref<1x2x128xf32, #tpu.memory_space<vmem>>, %arg7: memref<1x2x128xf32, #tpu.memory_space<vmem>>) attributes {dimension_semantics = [#tpu.dimension_semantics<parallel>, #tpu.dimension_semantics<parallel>], iteration_bounds = array<i64: 4, 1>, scalar_prefetch = 3 : i64, scratch_operands = 0 : i64, tpu.core_type = #tpu.core_type<tc>, window_params = [{transform_indices = @transform_0, window_bounds = array<i64: 3, 128>}, {transform_indices = @transform_1, window_bounds = array<i64: 1, 2, 128>}, {transform_indices = @transform_2, window_bounds = array<i64: 1, 2, 128>}]} {
    %0 = arith.index_cast %arg0 : i32 to index
    %1 = memref.load %arg2[%0] : memref<4xi32, #tpu.memory_space<smem>>
    %2 = arith.index_cast %arg0 : i32 to index
    %3 = memref.load %arg3[%2] : memref<4xi32, #tpu.memory_space<smem>>
    %4 = arith.index_cast %arg0 : i32 to index
    %5 = memref.load %arg4[%4] : memref<4xi32, #tpu.memory_space<smem>>
    %c0_i32 = arith.constant 0 : i32
    %6 = arith.cmpi ne, %5, %c0_i32 : i32
    %c0 = arith.constant 0 : index
    %c0_0 = arith.constant 0 : index
    %7 = vector.load %arg5[%c0, %c0_0] : memref<3x128xf32, #tpu.memory_space<vmem>>, vector<3x128xf32>
    %c0_1 = arith.constant 0 : index
    %c0_2 = arith.constant 0 : index
    %c0_3 = arith.constant 0 : index
    %8 = vector.load %arg6[%c0_1, %c0_2, %c0_3] : memref<1x2x128xf32, #tpu.memory_space<vmem>>, vector<1x2x128xf32>
    %9 = vector.shape_cast %8 : vector<1x2x128xf32> to vector<2x128xf32>
    %c1_i32 = arith.constant 1 : i32
    %10 = arith.subi %1, %c1_i32 : i32
    %11 = arith.sitofp %10 : i32 to f32
    %12 = vector.broadcast %11 : f32 to vector<3x128xf32>
    %13 = arith.mulf %7, %12 : vector<3x128xf32>
    %14 = math.floor %13 : vector<3x128xf32>
    %15 = arith.subf %13, %14 : vector<3x128xf32>
    %16 = arith.fptosi %14 : vector<3x128xf32> to vector<3x128xi32>
    %cst = arith.constant 1.000000e+00 : f32
    %17 = vector.broadcast %cst : f32 to vector<3x128xf32>
    %18 = arith.subf %17, %15 : vector<3x128xf32>
    %19 = vector.extract_strided_slice %16 {offsets = [0, 0], sizes = [1, 128], strides = [1, 1]} : vector<3x128xi32> to vector<1x128xi32>
    %c1_i32_4 = arith.constant 1 : i32
    %20 = vector.broadcast %c1_i32_4 : i32 to vector<1x128xi32>
    %21 = arith.addi %19, %20 : vector<1x128xi32>
    %c1_i32_5 = arith.constant 1 : i32
    %22 = vector.broadcast %c1_i32_5 : i32 to vector<1x128xi32>
    %23 = arith.muli %19, %22 : vector<1x128xi32>
    %c1_i32_6 = arith.constant 1 : i32
    %24 = vector.broadcast %c1_i32_6 : i32 to vector<1x128xi32>
    %25 = arith.muli %21, %24 : vector<1x128xi32>
    %c1_i32_7 = arith.constant 1 : i32
    %26 = vector.broadcast %c1_i32_7 : i32 to vector<1x128xi32>
    %27 = arith.muli %19, %26 : vector<1x128xi32>
    %c1_i32_8 = arith.constant 1 : i32
    %28 = vector.broadcast %c1_i32_8 : i32 to vector<1x128xi32>
    %29 = arith.muli %21, %28 : vector<1x128xi32>
    %30 = vector.extract_strided_slice %18 {offsets = [0, 0], sizes = [1, 128], strides = [1, 1]} : vector<3x128xf32> to vector<1x128xf32>
    %31 = vector.extract_strided_slice %15 {offsets = [0, 0], sizes = [1, 128], strides = [1, 1]} : vector<3x128xf32> to vector<1x128xf32>
    %c1_i32_9 = arith.constant 1 : i32
    %32 = arith.muli %c1_i32_9, %1 : i32
    %33 = vector.extract_strided_slice %16 {offsets = [1, 0], sizes = [1, 128], strides = [1, 1]} : vector<3x128xi32> to vector<1x128xi32>
    %c1_i32_10 = arith.constant 1 : i32
    %34 = vector.broadcast %c1_i32_10 : i32 to vector<1x128xi32>
    %35 = arith.addi %33, %34 : vector<1x128xi32>
    %36 = vector.broadcast %32 : i32 to vector<1x128xi32>
    %37 = arith.muli %33, %36 : vector<1x128xi32>
    %38 = vector.broadcast %32 : i32 to vector<1x128xi32>
    %39 = arith.muli %35, %38 : vector<1x128xi32>
    %c-1640531535_i32 = arith.constant -1640531535 : i32
    %40 = vector.broadcast %c-1640531535_i32 : i32 to vector<1x128xi32>
    %41 = arith.muli %33, %40 : vector<1x128xi32>
    %c-1640531535_i32_11 = arith.constant -1640531535 : i32
    %42 = vector.broadcast %c-1640531535_i32_11 : i32 to vector<1x128xi32>
    %43 = arith.muli %35, %42 : vector<1x128xi32>
    %44 = vector.extract_strided_slice %18 {offsets = [1, 0], sizes = [1, 128], strides = [1, 1]} : vector<3x128xf32> to vector<1x128xf32>
    %45 = vector.extract_strided_slice %15 {offsets = [1, 0], sizes = [1, 128], strides = [1, 1]} : vector<3x128xf32> to vector<1x128xf32>
    %46 = arith.muli %32, %1 : i32
    %47 = vector.extract_strided_slice %16 {offsets = [2, 0], sizes = [1, 128], strides = [1, 1]} : vector<3x128xi32> to vector<1x128xi32>
    %c1_i32_12 = arith.constant 1 : i32
    %48 = vector.broadcast %c1_i32_12 : i32 to vector<1x128xi32>
    %49 = arith.addi %47, %48 : vector<1x128xi32>
    %50 = vector.broadcast %46 : i32 to vector<1x128xi32>
    %51 = arith.muli %47, %50 : vector<1x128xi32>
    %52 = vector.broadcast %46 : i32 to vector<1x128xi32>
    %53 = arith.muli %49, %52 : vector<1x128xi32>
    %c805459861_i32 = arith.constant 805459861 : i32
    %54 = vector.broadcast %c805459861_i32 : i32 to vector<1x128xi32>
    %55 = arith.muli %47, %54 : vector<1x128xi32>
    %c805459861_i32_13 = arith.constant 805459861 : i32
    %56 = vector.broadcast %c805459861_i32_13 : i32 to vector<1x128xi32>
    %57 = arith.muli %49, %56 : vector<1x128xi32>
    %58 = vector.extract_strided_slice %18 {offsets = [2, 0], sizes = [1, 128], strides = [1, 1]} : vector<3x128xf32> to vector<1x128xf32>
    %59 = vector.extract_strided_slice %15 {offsets = [2, 0], sizes = [1, 128], strides = [1, 1]} : vector<3x128xf32> to vector<1x128xf32>
    %60 = tpu.iota {dimensions = array<i32: 0>} : vector<128x128xi32>
    %cst_14 = arith.constant 0.000000e+00 : f32
    %61 = vector.broadcast %cst_14 : f32 to vector<128x128xf32>
    %62 = arith.mulf %30, %44 : vector<1x128xf32>
    %63 = arith.addi %23, %37 : vector<1x128xi32>
    %64 = arith.xori %27, %41 : vector<1x128xi32>
    %65 = arith.mulf %62, %58 : vector<1x128xf32>
    %66 = arith.addi %63, %51 : vector<1x128xi32>
    %67 = arith.xori %64, %55 : vector<1x128xi32>
    %68 = vector.broadcast %3 : i32 to vector<1x128xi32>
    %69 = arith.andi %67, %68 : vector<1x128xi32>
    %70 = arith.select %6, %66, %69 : vector<1x128xi32>
    %71 = vector.broadcast %70 : vector<1x128xi32> to vector<128x128xi32>
    %72 = arith.cmpi eq, %60, %71 : vector<128x128xi32>
    %cst_15 = arith.constant 0.000000e+00 : f32
    %73 = vector.shape_cast %65 : vector<1x128xf32> to vector<1x128xf32>
    %74 = vector.broadcast %73 : vector<1x128xf32> to vector<128x128xf32>
    %75 = vector.broadcast %cst_15 : f32 to vector<128x128xf32>
    %76 = arith.select %72, %74, %75 : vector<128x128xi1>, vector<128x128xf32>
    %77 = arith.addf %61, %76 : vector<128x128xf32>
    %78 = arith.mulf %31, %44 : vector<1x128xf32>
    %79 = arith.addi %25, %37 : vector<1x128xi32>
    %80 = arith.xori %29, %41 : vector<1x128xi32>
    %81 = arith.mulf %78, %58 : vector<1x128xf32>
    %82 = arith.addi %79, %51 : vector<1x128xi32>
    %83 = arith.xori %80, %55 : vector<1x128xi32>
    %84 = vector.broadcast %3 : i32 to vector<1x128xi32>
    %85 = arith.andi %83, %84 : vector<1x128xi32>
    %86 = arith.select %6, %82, %85 : vector<1x128xi32>
    %87 = vector.broadcast %86 : vector<1x128xi32> to vector<128x128xi32>
    %88 = arith.cmpi eq, %60, %87 : vector<128x128xi32>
    %cst_16 = arith.constant 0.000000e+00 : f32
    %89 = vector.shape_cast %81 : vector<1x128xf32> to vector<1x128xf32>
    %90 = vector.broadcast %89 : vector<1x128xf32> to vector<128x128xf32>
    %91 = vector.broadcast %cst_16 : f32 to vector<128x128xf32>
    %92 = arith.select %88, %90, %91 : vector<128x128xi1>, vector<128x128xf32>
    %93 = arith.addf %77, %92 : vector<128x128xf32>
    %94 = arith.mulf %30, %45 : vector<1x128xf32>
    %95 = arith.addi %23, %39 : vector<1x128xi32>
    %96 = arith.xori %27, %43 : vector<1x128xi32>
    %97 = arith.mulf %94, %58 : vector<1x128xf32>
    %98 = arith.addi %95, %51 : vector<1x128xi32>
    %99 = arith.xori %96, %55 : vector<1x128xi32>
    %100 = vector.broadcast %3 : i32 to vector<1x128xi32>
    %101 = arith.andi %99, %100 : vector<1x128xi32>
    %102 = arith.select %6, %98, %101 : vector<1x128xi32>
    %103 = vector.broadcast %102 : vector<1x128xi32> to vector<128x128xi32>
    %104 = arith.cmpi eq, %60, %103 : vector<128x128xi32>
    %cst_17 = arith.constant 0.000000e+00 : f32
    %105 = vector.shape_cast %97 : vector<1x128xf32> to vector<1x128xf32>
    %106 = vector.broadcast %105 : vector<1x128xf32> to vector<128x128xf32>
    %107 = vector.broadcast %cst_17 : f32 to vector<128x128xf32>
    %108 = arith.select %104, %106, %107 : vector<128x128xi1>, vector<128x128xf32>
    %109 = arith.addf %93, %108 : vector<128x128xf32>
    %110 = arith.mulf %31, %45 : vector<1x128xf32>
    %111 = arith.addi %25, %39 : vector<1x128xi32>
    %112 = arith.xori %29, %43 : vector<1x128xi32>
    %113 = arith.mulf %110, %58 : vector<1x128xf32>
    %114 = arith.addi %111, %51 : vector<1x128xi32>
    %115 = arith.xori %112, %55 : vector<1x128xi32>
    %116 = vector.broadcast %3 : i32 to vector<1x128xi32>
    %117 = arith.andi %115, %116 : vector<1x128xi32>
    %118 = arith.select %6, %114, %117 : vector<1x128xi32>
    %119 = vector.broadcast %118 : vector<1x128xi32> to vector<128x128xi32>
    %120 = arith.cmpi eq, %60, %119 : vector<128x128xi32>
    %cst_18 = arith.constant 0.000000e+00 : f32
    %121 = vector.shape_cast %113 : vector<1x128xf32> to vector<1x128xf32>
    %122 = vector.broadcast %121 : vector<1x128xf32> to vector<128x128xf32>
    %123 = vector.broadcast %cst_18 : f32 to vector<128x128xf32>
    %124 = arith.select %120, %122, %123 : vector<128x128xi1>, vector<128x128xf32>
    %125 = arith.addf %109, %124 : vector<128x128xf32>
    %126 = arith.mulf %30, %44 : vector<1x128xf32>
    %127 = arith.addi %23, %37 : vector<1x128xi32>
    %128 = arith.xori %27, %41 : vector<1x128xi32>
    %129 = arith.mulf %126, %59 : vector<1x128xf32>
    %130 = arith.addi %127, %53 : vector<1x128xi32>
    %131 = arith.xori %128, %57 : vector<1x128xi32>
    %132 = vector.broadcast %3 : i32 to vector<1x128xi32>
    %133 = arith.andi %131, %132 : vector<1x128xi32>
    %134 = arith.select %6, %130, %133 : vector<1x128xi32>
    %135 = vector.broadcast %134 : vector<1x128xi32> to vector<128x128xi32>
    %136 = arith.cmpi eq, %60, %135 : vector<128x128xi32>
    %cst_19 = arith.constant 0.000000e+00 : f32
    %137 = vector.shape_cast %129 : vector<1x128xf32> to vector<1x128xf32>
    %138 = vector.broadcast %137 : vector<1x128xf32> to vector<128x128xf32>
    %139 = vector.broadcast %cst_19 : f32 to vector<128x128xf32>
    %140 = arith.select %136, %138, %139 : vector<128x128xi1>, vector<128x128xf32>
    %141 = arith.addf %125, %140 : vector<128x128xf32>
    %142 = arith.mulf %31, %44 : vector<1x128xf32>
    %143 = arith.addi %25, %37 : vector<1x128xi32>
    %144 = arith.xori %29, %41 : vector<1x128xi32>
    %145 = arith.mulf %142, %59 : vector<1x128xf32>
    %146 = arith.addi %143, %53 : vector<1x128xi32>
    %147 = arith.xori %144, %57 : vector<1x128xi32>
    %148 = vector.broadcast %3 : i32 to vector<1x128xi32>
    %149 = arith.andi %147, %148 : vector<1x128xi32>
    %150 = arith.select %6, %146, %149 : vector<1x128xi32>
    %151 = vector.broadcast %150 : vector<1x128xi32> to vector<128x128xi32>
    %152 = arith.cmpi eq, %60, %151 : vector<128x128xi32>
    %cst_20 = arith.constant 0.000000e+00 : f32
    %153 = vector.shape_cast %145 : vector<1x128xf32> to vector<1x128xf32>
    %154 = vector.broadcast %153 : vector<1x128xf32> to vector<128x128xf32>
    %155 = vector.broadcast %cst_20 : f32 to vector<128x128xf32>
    %156 = arith.select %152, %154, %155 : vector<128x128xi1>, vector<128x128xf32>
    %157 = arith.addf %141, %156 : vector<128x128xf32>
    %158 = arith.mulf %30, %45 : vector<1x128xf32>
    %159 = arith.addi %23, %39 : vector<1x128xi32>
    %160 = arith.xori %27, %43 : vector<1x128xi32>
    %161 = arith.mulf %158, %59 : vector<1x128xf32>
    %162 = arith.addi %159, %53 : vector<1x128xi32>
    %163 = arith.xori %160, %57 : vector<1x128xi32>
    %164 = vector.broadcast %3 : i32 to vector<1x128xi32>
    %165 = arith.andi %163, %164 : vector<1x128xi32>
    %166 = arith.select %6, %162, %165 : vector<1x128xi32>
    %167 = vector.broadcast %166 : vector<1x128xi32> to vector<128x128xi32>
    %168 = arith.cmpi eq, %60, %167 : vector<128x128xi32>
    %cst_21 = arith.constant 0.000000e+00 : f32
    %169 = vector.shape_cast %161 : vector<1x128xf32> to vector<1x128xf32>
    %170 = vector.broadcast %169 : vector<1x128xf32> to vector<128x128xf32>
    %171 = vector.broadcast %cst_21 : f32 to vector<128x128xf32>
    %172 = arith.select %168, %170, %171 : vector<128x128xi1>, vector<128x128xf32>
    %173 = arith.addf %157, %172 : vector<128x128xf32>
    %174 = arith.mulf %31, %45 : vector<1x128xf32>
    %175 = arith.addi %25, %39 : vector<1x128xi32>
    %176 = arith.xori %29, %43 : vector<1x128xi32>
    %177 = arith.mulf %174, %59 : vector<1x128xf32>
    %178 = arith.addi %175, %53 : vector<1x128xi32>
    %179 = arith.xori %176, %57 : vector<1x128xi32>
    %180 = vector.broadcast %3 : i32 to vector<1x128xi32>
    %181 = arith.andi %179, %180 : vector<1x128xi32>
    %182 = arith.select %6, %178, %181 : vector<1x128xi32>
    %183 = vector.broadcast %182 : vector<1x128xi32> to vector<128x128xi32>
    %184 = arith.cmpi eq, %60, %183 : vector<128x128xi32>
    %cst_22 = arith.constant 0.000000e+00 : f32
    %185 = vector.shape_cast %177 : vector<1x128xf32> to vector<1x128xf32>
    %186 = vector.broadcast %185 : vector<1x128xf32> to vector<128x128xf32>
    %187 = vector.broadcast %cst_22 : f32 to vector<128x128xf32>
    %188 = arith.select %184, %186, %187 : vector<128x128xi1>, vector<128x128xf32>
    %189 = arith.addf %173, %188 : vector<128x128xf32>
    %cst_23 = arith.constant dense<0.000000e+00> : vector<2x128xf32>
    %190 = tpu.matmul %9, %189, %cst_23 {dimension_numbers = #tpu.dot_dimension_numbers<[1], [0], [0], [1], [0, 0, 1, 1], [], []>, precision = #tpu.contract_precision<fp32>} : vector<2x128xf32>, vector<128x128xf32>, vector<2x128xf32> -> vector<2x128xf32>
    %c0_24 = arith.constant 0 : index
    %c0_25 = arith.constant 0 : index
    %c0_26 = arith.constant 0 : index
    %191 = vector.load %arg7[%c0_24, %c0_25, %c0_26] : memref<1x2x128xf32, #tpu.memory_space<vmem>>, vector<1x2x128xf32>
    %192 = vector.shape_cast %191 : vector<1x2x128xf32> to vector<2x128xf32>
    %193 = vector.shape_cast %190 : vector<2x128xf32> to vector<1x2x128xf32>
    tpu.vector_store %arg7[%c0_24, %c0_25, %c0_26], %193 {strides = array<i32>} : memref<1x2x128xf32, #tpu.memory_space<vmem>>, vector<1x2x128xf32>,
    return
  }
  func.func @transform_0(%arg0: i32, %arg1: i32, %arg2: memref<4xi32, #tpu.memory_space<smem>>, %arg3: memref<4xi32, #tpu.memory_space<smem>>, %arg4: memref<4xi32, #tpu.memory_space<smem>>) -> (i32, i32) {
    %c0_i32 = arith.constant 0 : i32
    %c0_i32_0 = arith.constant 0 : i32
    return %c0_i32, %arg1 : i32, i32
  }
  func.func @transform_1(%arg0: i32, %arg1: i32, %arg2: memref<4xi32, #tpu.memory_space<smem>>, %arg3: memref<4xi32, #tpu.memory_space<smem>>, %arg4: memref<4xi32, #tpu.memory_space<smem>>) -> (i32, i32, i32) {
    %c0_i32 = arith.constant 0 : i32
    %c0_i32_0 = arith.constant 0 : i32
    %c0_i32_1 = arith.constant 0 : i32
    return %arg0, %c0_i32, %c0_i32_0 : i32, i32, i32
  }
  func.func @transform_2(%arg0: i32, %arg1: i32, %arg2: memref<4xi32, #tpu.memory_space<smem>>, %arg3: memref<4xi32, #tpu.memory_space<smem>>, %arg4: memref<4xi32, #tpu.memory_space<smem>>) -> (i32, i32, i32) {
    %c0_i32 = arith.constant 0 : i32
    %c0_i32_0 = arith.constant 0 : i32
    return %arg0, %c0_i32, %arg1 : i32, i32, i32
  }
}

</mosaic_0001>

<bundles_post_ra>
// kernel: tpu_custom_call.1
= control target key start
LH: loop header
LB: loop body
LE: loop exit
PB: predicated region body
PF: predicated region fallthrough
CT: control target
= control target key end

     0   :  { %s3151_s0 = inlined_call_operand.hbm [shape: s32[4], index: 0, kind: input, shape index: {}]   ;;  %s3152_s3 = inlined_call_operand.vmem [shape: f32[3,128], index: 3, kind: input, shape index: {}]   ;;  %s3153_s4 = inlined_call_operand.vmem [shape: f32[4,2,128], index: 4, kind: input, shape index: {}]   ;;  %s3154_s5 = inlined_call_operand.hbm [shape: f32[4,2,128], index: 5, kind: output, shape index: {}]   ;;  %s3155_s1 = inlined_call_operand.vmem [shape: s32[4], index: 1, kind: input, shape index: {}]   ;;  %s3156_s2 = inlined_call_operand.vmem [shape: s32[4], index: 2, kind: input, shape index: {}]  }
   0x1   :  { %s2031_s20 = scalar_lea.hbm %s3151_s0, 16 }
   0x2   :  { %p2032_p0 = scmp.ne.s32.totalorder %s3151_s0, %s2031_s20  ;;  %p2035_p1 = scmp.lt.u32.totalorder %s2031_s20, %s3151_s0 }
   0x4   :  { %p2037_p2 = pnand %p2035_p1, %p2032_p0 }
   0x6   :  { %2040 = shalt.err (!%p2037_p2)  }
   0x7   :  { %s2147_s25 = smov [#allocation3]   ;;  %s12_s30 = sshll.u32 %s3155_s1, 4  ;;  %s13_s30 = int_to_ptr.vmem [resolvable:$true] %s12_s30 }
   0x8   :  { %11 = dma.hbm_to_smem %s3151_s0, 16, %s2147_s25, [#allocation2] }
   0x9   :  { %s16_s8 = sshll.u32 %s3156_s2, 4  ;;  %s2041_s9 = scalar_lea.vmem %s13_s30, 16  ;;  %s17_s8 = int_to_ptr.vmem [resolvable:$true] %s16_s8 }
   0xa   :  { %p2042_p3 = scmp.ne.s32.totalorder %s13_s30, %s2041_s9  ;;  %p2046_p4 = scmp.lt.s32.totalorder %s13_s30, %s13_s30 }
   0xb   :  { %p2047_p5 = scmp.lt.s32.totalorder %s2041_s9, %s2041_s9 }
   0xd   :  { %p2048_p6 = por %p2047_p5, %p2046_p4 }
   0xf   :  { %p2049_p7 = pnand %p2048_p6, %p2042_p3 }
  0x11   :  { %2052 = shalt.err (!%p2049_p7)  }
  0x12   :  { %s2148_s10 = smov [#allocation4]   ;;  %s2053_s0 = scalar_lea.vmem %s17_s8, 16 }
  0x13   :  { %15 = dma.vmem_to_smem %s13_s30, 16, %s2148_s10, [#allocation2] }
  0x14   :  { %p2054_p8 = scmp.ne.s32.totalorder %s17_s8, %s2053_s0  ;;  %p2058_p9 = scmp.lt.s32.totalorder %s17_s8, %s17_s8 }
  0x15   :  { %p2059_p10 = scmp.lt.s32.totalorder %s2053_s0, %s2053_s0 }
  0x17   :  { %p2060_p11 = por %p2059_p10, %p2058_p9 }
  0x19   :  { %p2061_p12 = pnand %p2060_p11, %p2054_p8 }
  0x1b   :  { %2064 = shalt.err (!%p2061_p12)  }
  0x1c   :  { %s2149_s1 = smov [#allocation5]  }
  0x1d   :  { %19 = dma.vmem_to_smem %s17_s8, 16, %s2149_s1, [#allocation2] }
  0x1e   :  { %2117 = dma.done.wait [#allocation2], 48 }
  0x1f   :  { %2118 = vsyncadd [#allocation2], 4294967248 }
  0x20   :  { %21 = sfence }
  0x21   :  { %22 = vsyncpa [#allocation7], 0 }
  0x22   :  { %24 = vsyncpa [#allocation7 + $0x1], 0  ;;  %s2202_s2 = smov 0   ;;  %s2204_s11 = smov 0  }
  0x23   :  { %s2206_s12 = smov 0   ;;  %s2208_s13 = smov 0  }
  0x24   :  { %s2210_s14 = smov 0   ;;  %s2212_s15 = smov 0  }
  0x25 LB: > { %s1490_s16 = sadd.s32 4294967295, %s2145_s15   ;;  %s1491_s17 = sadd.s32 4294967294, %s2145_s15   ;;  %s2145_s15 = sphi %s2212_s15, %s30_s15   ;;  %s2141_s14 = sphi %s2210_s14, %s3165_s14   ;;  %s2137_s13 = sphi %s2208_s13, %s3164_s13   ;;  %s2133_s12 = sphi %s2206_s12, %s3163_s12   ;;  %s2129_s11 = sphi %s2204_s11, %s3162_s11   ;;  %s2125_s2 = sphi %s2202_s2, %s3161_s2  }
  0x26   : > { %s42_s18 = sadd.s32 1, %s2141_s14  ;;  %s103_s19 = sadd.s32 1, %s2133_s12 }
  0x27   : > { %p44_p13 = scmp.ge.s32.totalorder %s42_s18, 4  ;;  %p113_p0 = scmp.ne.s32.totalorder %s2133_s12, %s2129_s11 }
  0x28   : > { %p114_p1 = scmp.eq.s32.totalorder %s1490_s16, 3  ;;  %p119_p2 = scmp.ne.s32.totalorder %s2129_s11, %s2125_s2 }
  0x29   : > { %s3167_s18 = smov (%p44_p13, %s42_s18), 0  ;;  %p120_p4 = scmp.eq.s32.totalorder %s1491_s17, 3 }
  0x2a   : > { %p2242_p3 = por %p114_p1, %p113_p0  ;;  %s98_s21 = ssub.s32 %s2141_s14, %s3167_s18 }
  0x2b   : > { %p1495_p5 = scmp.ge.s32.totalorder %s2145_s15, 1  ;;  %p101_p6 = scmp.eq.s32.totalorder %s98_s21, 0 }
  0x2c   : > { %p2249_p7 = por %p120_p4, %p119_p2  ;;  %p152_p8 = scmp.lt.s32.totalorder %s2145_s15, 5 }
  0x2d   : > { %s2255_s23 = scalar_select %p101_p6, %s2133_s12, %s103_s19  }
  0x2e   : > { %p153_p9 = pnand %p1495_p5, %p152_p8 }
  0x2f   : > { %s2258_s24 = sld [smem:[#allocation3 + %s2137_s13]] (!%p153_p9)  ;;  %v2150_v0 = vmov (!%p153_p9), 0.0|0.0   ;;  %v211_v1 = vlaneseq (!%p153_p9)  ;;  %v189_v2 = vld [vmem:[%s3152_s3] sm:$0x7] (!%p153_p9)  ;;  %p181_p11 = scmp.lt.s32.totalorder (!%p153_p9), %s2137_s13, 3 }
  0x30   : > { %156 = sbr.rel (%p153_p9) target bundleno = 492 (0x1ec), region = 28  ;;  %1815 = vmatprep.subr.bf16.mxu1 (!%p153_p9), %v2150_v0  ;;  %1887 = vmatprep.subr.bf16.mxu0 (!%p153_p9), %v2150_v0  ;;  %s187_s25 = sld [smem:[#allocation5 + %s2137_s13]] (!%p153_p9) }
  0x31   : > { %s186_s30 = sld [smem:[#allocation4 + %s2137_s13]] (!%p153_p9)  ;;  %v2268_v4 = vshrl.u32 (!%p153_p9), %v211_v1, 7  ;;  %s174_s16 = sand.u32 (!%p153_p9), 1, %s2129_s11  }
  0x32   : > { %s1496_s17 = sshll.u32 (!%p153_p9), %s174_s16, 1  ;;  %s1500_s19 = sshll.u32 (!%p153_p9), %s2137_s13, 5 }
  0x33   : > { %v2273_v7 = vadd.s32 (!%p153_p9), 8, %v2268_v4  ;;  %v2276_v8 = vsub.s32 (!%p153_p9), 0, %v2268_v4  ;;  %v2279_v9 = vadd.s32 (!%p153_p9), 16, %v2268_v4  ;;  %v2282_v10 = vadd.s32 (!%p153_p9), 24, %v2268_v4  ;;  %s176_s21 = scalar_lea.vmem (!%p153_p9), [#allocation6], %s1496_s17  ;;  %s3104_s27 = scalar_lea.hbm (!%p153_p9), %s3154_s5, %s1500_s19 }
  0x34   : > { %v2285_v13 = vadd.s32 (!%p153_p9), 32, %v2268_v4  ;;  %v2288_v14 = vadd.s32 (!%p153_p9), 40, %v2268_v4  ;;  %v2292_v17 = vadd.s32 (!%p153_p9), 48, %v2268_v4  ;;  %v2295_v18 = vadd.s32 (!%p153_p9), 56, %v2268_v4  ;;  %s1393_s28 = scalar_lea.sflag (!%p153_p9), [#allocation7], %s174_s16 }
  0x35   : > { %s1498_s26 = sadd.s32 (!%p153_p9), 4294967295, %s2258_s24  ;;  %s205_s7 = smul.u32 (!%p153_p9), %s2258_s24, %s2258_s24  ;;  %v200_v15 = vstv (!%p153_p9), %s2258_s24  ;;  %v2302_v25 = vadd.s32 (!%p153_p9), 64, %v2268_v4  ;;  %v2305_v26 = vadd.s32 (!%p153_p9), 72, %v2268_v4 }
  0x36   : > { %p188_p10 = scmp.ne.s32.totalorder (!%p153_p9), %s187_s25, 0  ;;  %s192_s29 = scvt.s32.f32 (!%p153_p9), %s1498_s26 }
  0x37   : > { %v206_v21 = vstv %s205_s7  ;;  %v2297_v23 = vstv %s186_s30  ;;  %s2761_s8 = scalar_select %p181_p11, %s2137_s13, 3 }
  0x38   : > { %v193_v3 = vstv %s192_s29  ;;  %s245_s6 = scalar_select %p188_p10, 1, 0 }
  0x39   : > { %v194_v5 = vmul.f32 %v193_v3, %v189_v2  ;;  %s1497_s9 = sshll.u32 %s2761_s8, 1  ;;  %s1407_s24 = sshll.u32 %s176_s21, 4  ;;  %s3106_s24 = int_to_ptr.vmem [resolvable:$true] %s1407_s24 }
  0x3a   : > { %v246_v16 = vstv %s245_s6  ;;  %s184_s1 = scalar_lea.vmem %s3153_s4, %s1497_s9  ;;  %s2065_s13 = scalar_lea.vmem %s3106_s24, 32 }
  0x3b   : > { %v195_v6 = vfloor.f32 %v194_v5  ;;  %vm2307_vm0 = vcmp.eq.s32.totalorder %v246_v16, 1  ;;  %p2066_p12 = scmp.ne.s32.totalorder %s3106_s24, %s2065_s13  ;;  %s2153_s29 = smov [#allocation6]  }
  0x3c   : > { %s2069_s30 = sshll.u32 %s2153_s29, 4  ;;  %s2070_s30 = int_to_ptr.vmem [resolvable:$false] %s2069_s30 }
  0x3d   : > { %v196_v11 = vsub.f32 %v194_v5, %v195_v6  ;;  %v1968_v12 = vtrunc.f32 %v195_v6  ;;  %p2067_p13 = pnand %p2066_p12, %p2242_p3  ;;  %s2071_s6 = scalar_lea.vmem %s2070_s30, 64 }
  0x3e   : > { %p2072_p1 = scmp.lt.s32.totalorder %s3106_s24, %s2070_s30  ;;  %p2073_p2 = scmp.lt.s32.totalorder %s2071_s6, %s2065_s13 }
  0x3f   : > { %v1969_v19 = vcvt.f32.s32 %v1968_v12  ;;  %v198_v20 = vsub.f32 1.0, %v196_v11  ;;  %v370_v22 = vrot.slane %v196_v11, 1  ;;  %v2299_v24 = vrot.slane %v196_v11, 2  ;;  %p2068_p0 = pneg %p2067_p13 }
  0x40   : > { %p2074_p4 = por %p2073_p2, %p2072_p1 }
  0x41   : > { %v199_v27 = vadd.s32 1, %v1969_v19  ;;  %v201_v28 = vmul.u32 %v1969_v19, %v200_v15  ;;  %v203_v29 = vmul.u32 2654435761, %v1969_v19  ;;  %v229_v30 = vrot.slane %v198_v20, 1 }
  0x42   : > { %v207_v32 = vmul.u32 %v1969_v19, %v206_v21  ;;  %v209_v33 = vmul.u32 805459861, %v1969_v19  ;;  %v236_v34 = vrot.slane %v198_v20, 2  ;;  %v2311_v35 = vmul.f32 %v370_v22, %v198_v20  ;;  %p2075_p5 = pnand %p2074_p4, %p2068_p0 }
  0x43   : > { %v202_v36 = vmul.u32 %v200_v15, %v199_v27  ;;  %v204_v37 = vmul.u32 2654435761, %v199_v27  ;;  %v231_v38 = vmul.f32 %v229_v30, %v198_v20  ;;  %v232_v39 = vrot.slane %v201_v28, 1 }
  0x44   : > { %v208_v40 = vmul.u32 %v206_v21, %v199_v27  ;;  %v210_v41 = vmul.u32 805459861, %v199_v27  ;;  %v234_v42 = vrot.slane %v203_v29, 1  ;;  %v239_v43 = vrot.slane %v207_v32, 2 }
  0x45   : > { %v233_v44 = vadd.s32 %v1969_v19, %v232_v39  ;;  %v238_v45 = vmul.f32 %v236_v34, %v231_v38  ;;  %v241_v46 = vrot.slane %v209_v33, 2  ;;  %v305_v47 = vmul.f32 %v229_v30, %v196_v11 }
  0x46   : > { %v235_v48 = vxor.u32 %v1969_v19, %v234_v42  ;;  %v306_v49 = vadd.s32 %v232_v39, %v199_v27  ;;  %v307_v50 = vxor.u32 %v234_v42, %v199_v27  ;;  %v373_v51 = vrot.slane %v202_v36, 1 }
  0x47   : > { %v240_v52 = vadd.s32 %v239_v43, %v233_v44  ;;  %v2314_v53 = vrot.slane %v238_v45, %v2276_v8  ;;  %v308_v54 = vmul.f32 %v305_v47, %v236_v34  ;;  %v375_v55 = vrot.slane %v204_v37, 1 }
  0x48   : > { %v242_v56 = vxor.u32 %v241_v46, %v235_v48  ;;  %v309_v57 = vadd.s32 %v306_v49, %v239_v43  ;;  %v310_v58 = vxor.u32 %v307_v50, %v241_v46  ;;  %v2316_v59 = vadd.s32 %v1969_v19, %v373_v51 }
  0x49   : > { %v2319_v60 = vrot.slane %v308_v54, %v2276_v8  ;;  %v2321_v61 = vxor.u32 %v1969_v19, %v375_v55  ;;  %v377_v62 = vmul.f32 %v2311_v35, %v236_v34  ;;  %v2324_v63 = vmul.f32 %v370_v22, %v196_v11 }
  0x4a   : > { %v244_v1 = vand.u32 %v2297_v23, %v242_v56  ;;  %v311_v2 = vand.u32 %v310_v58, %v2297_v23  ;;  %v378_v3 = vadd.s32 %v2316_v59, %v239_v43  ;;  %v2329_v5 = vadd.s32 %v373_v51, %v199_v27 }
  0x4b   : > { %v379_v6 = vxor.u32 %v2321_v61, %v241_v46  ;;  %v2333_v12 = vrot.slane %v377_v62, %v2276_v8  ;;  %v2335_v15 = vxor.u32 %v375_v55, %v199_v27  ;;  %v441_v16 = vmul.f32 %v2324_v63, %v236_v34 }
  0x4c   : > { %v248_v11 = vsel %vm2307_vm0, %v240_v52, %v244_v1  ;;  %v312_v19 = vsel %vm2307_vm0, %v309_v57, %v311_v2  ;;  %v442_v20 = vadd.s32 %v2329_v5, %v239_v43  ;;  %v504_v21 = vmul.f32 %v2299_v24, %v231_v38 }
  0x4d   : > { %v2345_v22 = vrot.slane %v248_v11, %v2276_v8  ;;  %v2348_v28 = vrot.slane %v312_v19, %v2276_v8  ;;  %v380_v27 = vand.u32 %v379_v6, %v2297_v23  ;;  %v443_v29 = vxor.u32 %v2335_v15, %v241_v46 }
  0x4e   : > { %v2353_v30 = vrot.slane %v441_v16, %v2276_v8  ;;  %v505_v32 = vrot.slane %v208_v40, 2  ;;  %v2355_v33 = vrot.slane %v210_v41, 2  ;;  %v2358_v34 = vrot.slane %v504_v21, %v2276_v8 }
  0x4f   : > { %vm253_vm1 = vcmp.eq.s32.totalorder %v2268_v4, %v2345_v22  ;;  %vm254_vm2 = vcmp.eq.s32.totalorder %v2273_v7, %v2345_v22  ;;  %vm317_vm3 = vcmp.eq.s32.totalorder %v2268_v4, %v2348_v28  ;;  %vm318_vm4 = vcmp.eq.s32.totalorder %v2273_v7, %v2348_v28 }
  0x50   : > { %v273_v36 = vsel %vm253_vm1, %v2314_v53, 0.0  ;;  %v274_v37 = vsel %vm254_vm2, %v2314_v53, 0.0  ;;  %v337_v38 = vsel %vm317_vm3, %v2319_v60, 0.0  ;;  %v338_v39 = vsel %vm318_vm4, %v2319_v60, 0.0 }
  0x51   : > { %v353_v40 = vadd.f32 %v337_v38, %v273_v36  ;;  %v354_v41 = vadd.f32 %v338_v39, %v274_v37  ;;  %v381_v42 = vsel %vm2307_vm0, %v378_v3, %v380_v27  ;;  %v444_v43 = vand.u32 %v443_v29, %v2297_v23 }
  0x52   : > { %v2376_v45 = vrot.slane %v381_v42, %v2276_v8  ;;  %v506_v46 = vadd.s32 %v505_v32, %v233_v44  ;;  %v508_v51 = vxor.u32 %v2355_v33, %v235_v48  ;;  %v567_v52 = vmul.f32 %v2299_v24, %v305_v47 }
  0x53   : > { %v445_v54 = vsel %vm2307_vm0, %v442_v20, %v444_v43  ;;  %v568_v55 = vadd.s32 %v505_v32, %v306_v49  ;;  %v569_v56 = vxor.u32 %v2355_v33, %v307_v50  ;;  %v628_v57 = vmul.f32 %v2299_v24, %v2311_v35 }
  0x54   : > { %vm386_vm5 = vcmp.eq.s32.totalorder %v2268_v4, %v2376_v45  ;;  %vm387_vm6 = vcmp.eq.s32.totalorder %v2273_v7, %v2376_v45  ;;  %v2390_v44 = vrot.slane %v445_v54, %v2276_v8  ;;  %v509_v47 = vand.u32 %v508_v51, %v2297_v23 }
  0x55   : > { %v406_v48 = vsel %vm386_vm5, %v2333_v12, 0.0  ;;  %v407_v49 = vsel %vm387_vm6, %v2333_v12, 0.0  ;;  %v570_v50 = vand.u32 %v569_v56, %v2297_v23  ;;  %v2397_v58 = vrot.slane %v567_v52, %v2276_v8 }
  0x56   : > { %v422_v35 = vadd.f32 %v406_v48, %v353_v40  ;;  %v423_v62 = vadd.f32 %v407_v49, %v354_v41  ;;  %vm450_vm7 = vcmp.eq.s32.totalorder %v2268_v4, %v2390_v44  ;;  %vm451_vm8 = vcmp.eq.s32.totalorder %v2273_v7, %v2390_v44 }
  0x57   : > { %v470_v1 = vsel %vm450_vm7, %v2353_v30, 0.0  ;;  %v471_v2 = vsel %vm451_vm8, %v2353_v30, 0.0  ;;  %v510_v3 = vsel %vm2307_vm0, %v506_v46, %v509_v47  ;;  %v571_v6 = vsel %vm2307_vm0, %v568_v55, %v570_v50 }
  0x58   : > { %v486_v16 = vadd.f32 %v470_v1, %v422_v35  ;;  %v487_v11 = vadd.f32 %v471_v2, %v423_v62  ;;  %v2410_v19 = vrot.slane %v510_v3, %v2276_v8  ;;  %v2413_v20 = vrot.slane %v571_v6, %v2276_v8 }
  0x59   : > { %v629_v21 = vadd.s32 %v505_v32, %v2316_v59  ;;  %v630_v27 = vxor.u32 %v2355_v33, %v2321_v61  ;;  %v2419_v29 = vrot.slane %v628_v57, %v2276_v8  ;;  %v689_v36 = vmul.f32 %v2299_v24, %v2324_v63 }
  0x5a   : > { %vm515_vm9 = vcmp.eq.s32.totalorder %v2268_v4, %v2410_v19  ;;  %vm516_vm10 = vcmp.eq.s32.totalorder %v2273_v7, %v2410_v19  ;;  %vm576_vm11 = vcmp.eq.s32.totalorder %v2268_v4, %v2413_v20  ;;  %vm577_vm12 = vcmp.eq.s32.totalorder %v2273_v7, %v2413_v20 }
  0x5b   : > { %v535_v59 = vsel %vm515_vm9, %v2358_v34, 0.0  ;;  %v536_v61 = vsel %vm516_vm10, %v2358_v34, 0.0  ;;  %v596_v37 = vsel %vm576_vm11, %v2397_v58, 0.0  ;;  %v597_v24 = vsel %vm577_vm12, %v2397_v58, 0.0 }
  0x5c   : > { %v551_v63 = vadd.f32 %v535_v59, %v486_v16  ;;  %v552_v38 = vadd.f32 %v536_v61, %v487_v11  ;;  %v631_v39 = vand.u32 %v630_v27, %v2297_v23  ;;  %v690_v40 = vadd.s32 %v505_v32, %v2329_v5 }
  0x5d   : > { %v691_v41 = vxor.u32 %v2355_v33, %v2335_v15  ;;  %v2440_v42 = vrot.slane %v689_v36, %v2276_v8  ;;  %vm255_vm13 = vcmp.eq.s32.totalorder %v2279_v9, %v2345_v22  ;;  %vm256_vm14 = vcmp.eq.s32.totalorder %v2282_v10, %v2345_v22 }
  0x5e   : > { %v612_v43 = vadd.f32 %v596_v37, %v551_v63  ;;  %v613_v46 = vadd.f32 %v597_v24, %v552_v38  ;;  %v632_v51 = vsel %vm2307_vm0, %v629_v21, %v631_v39  ;;  %v275_v52 = vsel %vm255_vm13, %v2314_v53, 0.0 }
  0x5f   : > { %v2450_v5 = vrot.slane %v632_v51, %v2276_v8  ;;  %v692_v15 = vand.u32 %v691_v41, %v2297_v23  ;;  %v276_v32 = vsel %vm256_vm14, %v2314_v53, 0.0  ;;  %vm319_vm15 = vcmp.eq.s32.totalorder %v2279_v9, %v2348_v28 }
  0x60   : > { %vm320_vm1 = vcmp.eq.s32.totalorder %v2282_v10, %v2348_v28  ;;  %v339_v33 = vsel %vm319_vm15, %v2319_v60, 0.0  ;;  %vm388_vm2 = vcmp.eq.s32.totalorder %v2279_v9, %v2376_v45  ;;  %vm389_vm3 = vcmp.eq.s32.totalorder %v2282_v10, %v2376_v45 }
  0x61   : > { %vm637_vm4 = vcmp.eq.s32.totalorder %v2268_v4, %v2450_v5  ;;  %vm638_vm5 = vcmp.eq.s32.totalorder %v2273_v7, %v2450_v5  ;;  %v693_v23 = vsel %vm2307_vm0, %v690_v40, %v692_v15  ;;  %v340_v54 = vsel %vm320_vm1, %v2319_v60, 0.0 }
  0x62   : > { %v657_v55 = vsel %vm637_vm4, %v2419_v29, 0.0  ;;  %v658_v56 = vsel %vm638_vm5, %v2419_v29, 0.0  ;;  %v2473_v57 = vrot.slane %v693_v23, %v2276_v8  ;;  %v355_v47 = vadd.f32 %v339_v33, %v275_v52 }
  0x63   : > { %v673_v48 = vadd.f32 %v657_v55, %v612_v43  ;;  %v674_v49 = vadd.f32 %v658_v56, %v613_v46  ;;  %v356_v50 = vadd.f32 %v340_v54, %v276_v32  ;;  %v408_v35 = vsel %vm388_vm2, %v2333_v12, 0.0 }
  0x64   : > { %vm698_vm6 = vcmp.eq.s32.totalorder %v2268_v4, %v2473_v57  ;;  %vm699_vm0 = vcmp.eq.s32.totalorder %v2273_v7, %v2473_v57  ;;  %v409_v31 = vsel %vm389_vm3, %v2333_v12, 0.0  ;;  %v424_v62 = vadd.f32 %v408_v35, %v355_v47 }
  0x65   : > { %v718_v1 = vsel %vm698_vm6, %v2440_v42, 0.0  ;;  %v719_v8 = vsel %vm699_vm0, %v2440_v42, 0.0  ;;  %v425_v2 = vadd.f32 %v409_v31, %v356_v50  ;;  %vm452_vm7 = vcmp.eq.s32.totalorder %v2279_v9, %v2390_v44 }
  0x66   : > { %v734_v3 = vadd.f32 %v718_v1, %v673_v48  ;;  %v735_v6 = vadd.f32 %v719_v8, %v674_v49  ;;  %vm453_vm8 = vcmp.eq.s32.totalorder %v2282_v10, %v2390_v44  ;;  %v472_v16 = vsel %vm452_vm7, %v2353_v30, 0.0 }
  0x67   : > { %v473_v7 = vsel %vm453_vm8, %v2353_v30, 0.0  ;;  %v488_v11 = vadd.f32 %v472_v16, %v424_v62  ;;  %vm517_vm9 = vcmp.eq.s32.totalorder %v2279_v9, %v2410_v19  ;;  %vm518_vm10 = vcmp.eq.s32.totalorder %v2282_v10, %v2410_v19 }
  0x68   : > { %v751_v21 = vand.u32 4294901760, %v734_v3  ;;  %v754_v27 = vand.u32 4294901760, %v735_v6  ;;  %v489_v36 = vadd.f32 %v473_v7, %v425_v2  ;;  %v537_v59 = vsel %vm517_vm9, %v2358_v34, 0.0 }
  0x69   : > { %v538_v61 = vsel %vm518_vm10, %v2358_v34, 0.0  ;;  %v553_v37 = vadd.f32 %v537_v59, %v488_v11  ;;  %vm578_vm11 = vcmp.eq.s32.totalorder %v2279_v9, %v2413_v20  ;;  %vm579_vm12 = vcmp.eq.s32.totalorder %v2282_v10, %v2413_v20 }
  0x6a   : > { %v2499_v24 = vpack.c.bf16 %v754_v27, %v751_v21  ;;  %v2501_v63 = vsub.f32 %v734_v3, %v751_v21  ;;  %v2503_v38 = vsub.f32 %v735_v6, %v754_v27  ;;  %v554_v39 = vadd.f32 %v538_v61, %v489_v36 }
  0x6b   : > { %v598_v40 = vsel %vm578_vm11, %v2397_v58, 0.0  ;;  %v599_v41 = vsel %vm579_vm12, %v2397_v58, 0.0  ;;  %vm639_vm13 = vcmp.eq.s32.totalorder %v2279_v9, %v2450_v5  ;;  %vm640_vm14 = vcmp.eq.s32.totalorder %v2282_v10, %v2450_v5 }
  0x6c   : > { %1817 = vmatpush3.bf16.msra.mxu1 %v2499_v24  ;;  %1889 = vmatpush3.bf16.msra.mxu0 %v2499_v24  ;;  %v614_v43 = vadd.f32 %v598_v40, %v553_v37  ;;  %v615_v46 = vadd.f32 %v599_v41, %v554_v39  ;;  %v659_v51 = vsel %vm639_vm13, %v2419_v29, 0.0  ;;  %v660_v52 = vsel %vm640_vm14, %v2419_v29, 0.0 }
  0x6d   : > { %1818 = vmatprep.subr.bf16.mxu1 %v2150_v0  ;;  %1890 = vmatprep.subr.bf16.mxu0 %v2150_v0  ;;  %vm700_vm15 = vcmp.eq.s32.totalorder %v2279_v9, %v2473_v57  ;;  %vm701_vm1 = vcmp.eq.s32.totalorder %v2282_v10, %v2473_v57  ;;  %vm257_vm2 = vcmp.eq.s32.totalorder %v2285_v13, %v2345_v22  ;;  %vm2151_vm14 = vmmov 0  }
  0x6e   : > { %v675_v15 = vadd.f32 %v659_v51, %v614_v43  ;;  %v676_v32 = vadd.f32 %v660_v52, %v615_v46  ;;  %v720_v33 = vsel %vm700_vm15, %v2440_v42, 0.0  ;;  %v721_v23 = vsel %vm701_vm1, %v2440_v42, 0.0 }
  0x6f   : > { %vm258_vm3 = vcmp.eq.s32.totalorder %v2288_v14, %v2345_v22  ;;  %v277_v54 = vsel %vm257_vm2, %v2314_v53, 0.0  ;;  %vm321_vm4 = vcmp.eq.s32.totalorder %v2285_v13, %v2348_v28  ;;  %vm322_vm5 = vcmp.eq.s32.totalorder %v2288_v14, %v2348_v28 }
  0x70   : > { %v736_v9 = vadd.f32 %v720_v33, %v675_v15  ;;  %v737_v10 = vadd.f32 %v721_v23, %v676_v32  ;;  %v278_v55 = vsel %vm258_vm3, %v2314_v53, 0.0  ;;  %v341_v56 = vsel %vm321_vm4, %v2319_v60, 0.0 }
  0x71   : > { %v342_v47 = vsel %vm322_vm5, %v2319_v60, 0.0  ;;  %v357_v48 = vadd.f32 %v341_v56, %v277_v54  ;;  %vm390_vm6 = vcmp.eq.s32.totalorder %v2285_v13, %v2376_v45  ;;  %vm391_vm0 = vcmp.eq.s32.totalorder %v2288_v14, %v2376_v45 }
  0x72   : > { %v757_v49 = vand.u32 4294901760, %v736_v9  ;;  %v760_v50 = vand.u32 4294901760, %v737_v10  ;;  %v358_v35 = vadd.f32 %v342_v47, %v278_v55  ;;  %v410_v31 = vsel %vm390_vm6, %v2333_v12, 0.0 }
  0x73   : > { %v411_v62 = vsel %vm391_vm0, %v2333_v12, 0.0  ;;  %v426_v1 = vadd.f32 %v410_v31, %v357_v48  ;;  %vm454_vm7 = vcmp.eq.s32.totalorder %v2285_v13, %v2390_v44  ;;  %vm455_vm8 = vcmp.eq.s32.totalorder %v2288_v14, %v2390_v44 }
  0x74   : > { %v2545_v8 = vpack.c.bf16 %v760_v50, %v757_v49  ;;  %v2547_v2 = vsub.f32 %v736_v9, %v757_v49  ;;  %v2549_v3 = vsub.f32 %v737_v10, %v760_v50  ;;  %v427_v6 = vadd.f32 %v411_v62, %v358_v35 }
  0x75   : > { %v474_v16 = vsel %vm454_vm7, %v2353_v30, 0.0  ;;  %v475_v7 = vsel %vm455_vm8, %v2353_v30, 0.0  ;;  %vm519_vm9 = vcmp.eq.s32.totalorder %v2285_v13, %v2410_v19  ;;  %vm520_vm10 = vcmp.eq.s32.totalorder %v2288_v14, %v2410_v19 }
  0x76   : > { %1820 = vmatpush3.bf16.msra.mxu1 %v2545_v8  ;;  %1892 = vmatpush3.bf16.msra.mxu0 %v2545_v8  ;;  %v490_v11 = vadd.f32 %v474_v16, %v426_v1  ;;  %v491_v21 = vadd.f32 %v475_v7, %v427_v6  ;;  %v539_v27 = vsel %vm519_vm9, %v2358_v34, 0.0  ;;  %v540_v36 = vsel %vm520_vm10, %v2358_v34, 0.0 }
  0x77   : > { %1821 = vmatprep.subr.bf16.mxu1 %v2150_v0  ;;  %1893 = vmatprep.subr.bf16.mxu0 %v2150_v0  ;;  %vm580_vm11 = vcmp.eq.s32.totalorder %v2285_v13, %v2413_v20  ;;  %vm581_vm12 = vcmp.eq.s32.totalorder %v2288_v14, %v2413_v20  ;;  %vm641_vm13 = vcmp.eq.s32.totalorder %v2285_v13, %v2450_v5  ;;  %v2152_v40 = vmov 0.0  }
  0x78   : > { %v555_v59 = vadd.f32 %v539_v27, %v490_v11  ;;  %v556_v61 = vadd.f32 %v540_v36, %v491_v21  ;;  %v600_v37 = vsel %vm580_vm11, %v2397_v58, 0.0  ;;  %v601_v39 = vsel %vm581_vm12, %v2397_v58, 0.0  ;;  %1637 = vmatprep.mubr.msk.f32.mxu1 %vm2151_vm14, %v2152_v40  ;;  %1742 = vmatprep.mubr.msk.f32.mxu0 %vm2151_vm14, %v2152_v40 }
  0x79   : > { %vm642_vm15 = vcmp.eq.s32.totalorder %v2288_v14, %v2450_v5  ;;  %v661_v41 = vsel %vm641_vm13, %v2419_v29, 0.0  ;;  %vm702_vm1 = vcmp.eq.s32.totalorder %v2285_v13, %v2473_v57  ;;  %vm703_vm2 = vcmp.eq.s32.totalorder %v2288_v14, %v2473_v57 }
  0x7a   : > { %v616_v43 = vadd.f32 %v600_v37, %v555_v59  ;;  %v617_v46 = vadd.f32 %v601_v39, %v556_v61  ;;  %v662_v51 = vsel %vm642_vm15, %v2419_v29, 0.0  ;;  %v722_v52 = vsel %vm702_vm1, %v2440_v42, 0.0 }
  0x7b   : > { %v723_v15 = vsel %vm703_vm2, %v2440_v42, 0.0  ;;  %vm259_vm3 = vcmp.eq.s32.totalorder %v2292_v17, %v2345_v22  ;;  %vm260_vm4 = vcmp.eq.s32.totalorder %v2295_v18, %v2345_v22  ;;  %vm323_vm5 = vcmp.eq.s32.totalorder %v2292_v17, %v2348_v28 }
  0x7c   : > { %v677_v13 = vadd.f32 %v661_v41, %v616_v43  ;;  %v678_v32 = vadd.f32 %v662_v51, %v617_v46  ;;  %v279_v14 = vsel %vm259_vm3, %v2314_v53, 0.0  ;;  %v280_v33 = vsel %vm260_vm4, %v2314_v53, 0.0 }
  0x7d   : > { %vm324_vm6 = vcmp.eq.s32.totalorder %v2295_v18, %v2348_v28  ;;  %v343_v23 = vsel %vm323_vm5, %v2319_v60, 0.0  ;;  %vm392_vm0 = vcmp.eq.s32.totalorder %v2292_v17, %v2376_v45  ;;  %vm393_vm7 = vcmp.eq.s32.totalorder %v2295_v18, %v2376_v45 }
  0x7e   : > { %v738_v54 = vadd.f32 %v722_v52, %v677_v13  ;;  %v739_v9 = vadd.f32 %v723_v15, %v678_v32  ;;  %v344_v10 = vsel %vm324_vm6, %v2319_v60, 0.0  ;;  %v359_v55 = vadd.f32 %v343_v23, %v279_v14 }
  0x7f   : > { %v360_v56 = vadd.f32 %v344_v10, %v280_v33  ;;  %v412_v47 = vsel %vm392_vm0, %v2333_v12, 0.0  ;;  %v413_v48 = vsel %vm393_vm7, %v2333_v12, 0.0  ;;  %vm456_vm8 = vcmp.eq.s32.totalorder %v2292_v17, %v2390_v44 }
  0x80   : > { %v763_v49 = vand.u32 4294901760, %v738_v54  ;;  %v766_v50 = vand.u32 4294901760, %v739_v9  ;;  %v428_v35 = vadd.f32 %v412_v47, %v359_v55  ;;  %vm457_vm9 = vcmp.eq.s32.totalorder %v2295_v18, %v2390_v44 }
  0x81   : > { %v429_v31 = vadd.f32 %v413_v48, %v360_v56  ;;  %v476_v62 = vsel %vm456_vm8, %v2353_v30, 0.0  ;;  %v477_v1 = vsel %vm457_vm9, %v2353_v30, 0.0  ;;  %vm521_vm10 = vcmp.eq.s32.totalorder %v2292_v17, %v2410_v19 }
  0x82   : > { %v2611_v6 = vpack.c.bf16 %v766_v50, %v763_v49  ;;  %v2613_v16 = vsub.f32 %v738_v54, %v763_v49  ;;  %v2615_v7 = vsub.f32 %v739_v9, %v766_v50  ;;  %v492_v11 = vadd.f32 %v476_v62, %v428_v35 }
  0x83   : > { %v493_v21 = vadd.f32 %v477_v1, %v429_v31  ;;  %vm522_vm11 = vcmp.eq.s32.totalorder %v2295_v18, %v2410_v19  ;;  %v541_v27 = vsel %vm521_vm10, %v2358_v34, 0.0  ;;  %vm582_vm12 = vcmp.eq.s32.totalorder %v2292_v17, %v2413_v20 }
  0x84   : > { %1823 = vmatpush3.bf16.msra.mxu1 %v2611_v6  ;;  %1895 = vmatpush3.bf16.msra.mxu0 %v2611_v6  ;;  %v542_v36 = vsel %vm522_vm11, %v2358_v34, 0.0  ;;  %v557_v59 = vadd.f32 %v541_v27, %v492_v11  ;;  %vm583_vm13 = vcmp.eq.s32.totalorder %v2295_v18, %v2413_v20  ;;  %v602_v61 = vsel %vm582_vm12, %v2397_v58, 0.0 }
  0x85   : > { %1824 = vmatprep.subr.bf16.mxu1 %v2150_v0  ;;  %1896 = vmatprep.subr.bf16.mxu0 %v2150_v0  ;;  %v558_v37 = vadd.f32 %v542_v36, %v493_v21  ;;  %v603_v39 = vsel %vm583_vm13, %v2397_v58, 0.0  ;;  %vm643_vm15 = vcmp.eq.s32.totalorder %v2292_v17, %v2450_v5  ;;  %vm644_vm1 = vcmp.eq.s32.totalorder %v2295_v18, %v2450_v5 }
  0x86   : > { %v618_v41 = vadd.f32 %v602_v61, %v557_v59  ;;  %v663_v43 = vsel %vm643_vm15, %v2419_v29, 0.0  ;;  %v664_v46 = vsel %vm644_vm1, %v2419_v29, 0.0  ;;  %vm704_vm2 = vcmp.eq.s32.totalorder %v2292_v17, %v2473_v57 }
  0x87   : > { %v619_v51 = vadd.f32 %v603_v39, %v558_v37  ;;  %vm705_vm3 = vcmp.eq.s32.totalorder %v2295_v18, %v2473_v57  ;;  %v724_v52 = vsel %vm704_vm2, %v2440_v42, 0.0  ;;  %vm261_vm4 = vcmp.eq.s32.totalorder %v2302_v25, %v2345_v22 }
  0x88   : > { %v679_v15 = vadd.f32 %v663_v43, %v618_v41  ;;  %v725_v13 = vsel %vm705_vm3, %v2440_v42, 0.0  ;;  %vm262_vm5 = vcmp.eq.s32.totalorder %v2305_v26, %v2345_v22  ;;  %v281_v32 = vsel %vm261_vm4, %v2314_v53, 0.0 }
  0x89   : > { %v680_v14 = vadd.f32 %v664_v46, %v619_v51  ;;  %v282_v17 = vsel %vm262_vm5, %v2314_v53, 0.0  ;;  %vm325_vm6 = vcmp.eq.s32.totalorder %v2302_v25, %v2348_v28  ;;  %vm326_vm0 = vcmp.eq.s32.totalorder %v2305_v26, %v2348_v28 }
  0x8a   : > { %v2653_v18 = vadd.f32 %v724_v52, %v679_v15  ;;  %v345_v33 = vsel %vm325_vm6, %v2319_v60, 0.0  ;;  %v346_v23 = vsel %vm326_vm0, %v2319_v60, 0.0  ;;  %vm394_vm7 = vcmp.eq.s32.totalorder %v2302_v25, %v2376_v45 }
  0x8b   : > { %v2659_v54 = vadd.f32 %v725_v13, %v680_v14  ;;  %v361_v9 = vadd.f32 %v345_v33, %v281_v32  ;;  %v362_v10 = vadd.f32 %v346_v23, %v282_v17  ;;  %vm395_vm8 = vcmp.eq.s32.totalorder %v2305_v26, %v2376_v45 }
  0x8c   : > { %v769_v55 = vand.u32 4294901760, %v2653_v18  ;;  %v414_v56 = vsel %vm394_vm7, %v2333_v12, 0.0  ;;  %v415_v47 = vsel %vm395_vm8, %v2333_v12, 0.0  ;;  %vm458_vm9 = vcmp.eq.s32.totalorder %v2302_v25, %v2390_v44 }
  0x8d   : > { %v772_v48 = vand.u32 4294901760, %v2659_v54  ;;  %v430_v49 = vadd.f32 %v414_v56, %v361_v9  ;;  %v431_v50 = vadd.f32 %v415_v47, %v362_v10  ;;  %vm459_vm10 = vcmp.eq.s32.totalorder %v2305_v26, %v2390_v44 }
  0x8e   : > { %v478_v35 = vsel %vm458_vm9, %v2353_v30, 0.0  ;;  %v479_v31 = vsel %vm459_vm10, %v2353_v30, 0.0  ;;  %vm523_vm11 = vcmp.eq.s32.totalorder %v2302_v25, %v2410_v19  ;;  %v2676_v62 = vadd.s32 80, %v2268_v4 }
  0x8f   : > { %v2682_v1 = vpack.c.bf16 %v772_v48, %v769_v55  ;;  %v494_v11 = vadd.f32 %v478_v35, %v430_v49  ;;  %v495_v21 = vadd.f32 %v479_v31, %v431_v50  ;;  %v2685_v27 = vadd.s32 88, %v2268_v4 }
  0x90   : > { %vm524_vm12 = vcmp.eq.s32.totalorder %v2305_v26, %v2410_v19  ;;  %v543_v36 = vsel %vm523_vm11, %v2358_v34, 0.0  ;;  %vm584_vm13 = vcmp.eq.s32.totalorder %v2302_v25, %v2413_v20  ;;  %vm585_vm15 = vcmp.eq.s32.totalorder %v2305_v26, %v2413_v20 }
  0x91   : > { %1826 = vmatpush3.bf16.msra.mxu1 %v2682_v1  ;;  %1898 = vmatpush3.bf16.msra.mxu0 %v2682_v1  ;;  %v544_v59 = vsel %vm524_vm12, %v2358_v34, 0.0  ;;  %v559_v61 = vadd.f32 %v543_v36, %v494_v11  ;;  %v604_v37 = vsel %vm584_vm13, %v2397_v58, 0.0  ;;  %v605_v39 = vsel %vm585_vm15, %v2397_v58, 0.0 }
  0x92   : > { %1827 = vmatprep.subr.bf16.mxu1 %v2150_v0  ;;  %1899 = vmatprep.subr.bf16.mxu0 %v2150_v0  ;;  %v560_v41 = vadd.f32 %v544_v59, %v495_v21  ;;  %vm645_vm1 = vcmp.eq.s32.totalorder %v2302_v25, %v2450_v5  ;;  %vm646_vm2 = vcmp.eq.s32.totalorder %v2305_v26, %v2450_v5  ;;  %v2747_v59 = vadd.s32 96, %v2268_v4 }
  0x93   : > { %v620_v43 = vadd.f32 %v604_v37, %v559_v61  ;;  %v665_v46 = vsel %vm645_vm1, %v2419_v29, 0.0  ;;  %v666_v51 = vsel %vm646_vm2, %v2419_v29, 0.0  ;;  %vm706_vm3 = vcmp.eq.s32.totalorder %v2302_v25, %v2473_v57 }
  0x94   : > { %v621_v52 = vadd.f32 %v605_v39, %v560_v41  ;;  %vm707_vm4 = vcmp.eq.s32.totalorder %v2305_v26, %v2473_v57  ;;  %v726_v15 = vsel %vm706_vm3, %v2440_v42, 0.0  ;;  %vm263_vm5 = vcmp.eq.s32.totalorder %v2676_v62, %v2345_v22 }
  0x95   : > { %v681_v13 = vadd.f32 %v665_v46, %v620_v43  ;;  %v727_v32 = vsel %vm707_vm4, %v2440_v42, 0.0  ;;  %vm264_vm6 = vcmp.eq.s32.totalorder %v2685_v27, %v2345_v22  ;;  %v283_v14 = vsel %vm263_vm5, %v2314_v53, 0.0 }
  0x96   : > { %v682_v17 = vadd.f32 %v666_v51, %v621_v52  ;;  %v284_v25 = vsel %vm264_vm6, %v2314_v53, 0.0  ;;  %vm327_vm0 = vcmp.eq.s32.totalorder %v2676_v62, %v2348_v28  ;;  %vm328_vm7 = vcmp.eq.s32.totalorder %v2685_v27, %v2348_v28 }
  0x97   : > { %v2723_v26 = vadd.f32 %v726_v15, %v681_v13  ;;  %v347_v33 = vsel %vm327_vm0, %v2319_v60, 0.0  ;;  %v348_v23 = vsel %vm328_vm7, %v2319_v60, 0.0  ;;  %vm396_vm8 = vcmp.eq.s32.totalorder %v2676_v62, %v2376_v45 }
  0x98   : > { %v2729_v9 = vadd.f32 %v727_v32, %v682_v17  ;;  %v363_v10 = vadd.f32 %v347_v33, %v283_v14  ;;  %v364_v56 = vadd.f32 %v348_v23, %v284_v25  ;;  %vm397_vm9 = vcmp.eq.s32.totalorder %v2685_v27, %v2376_v45 }
  0x99   : > { %v775_v47 = vand.u32 4294901760, %v2723_v26  ;;  %v416_v49 = vsel %vm396_vm8, %v2333_v12, 0.0  ;;  %v417_v50 = vsel %vm397_vm9, %v2333_v12, 0.0  ;;  %vm460_vm10 = vcmp.eq.s32.totalorder %v2676_v62, %v2390_v44 }
  0x9a   : > { %v778_v35 = vand.u32 4294901760, %v2729_v9  ;;  %v432_v31 = vadd.f32 %v416_v49, %v363_v10  ;;  %v433_v11 = vadd.f32 %v417_v50, %v364_v56  ;;  %vm461_vm11 = vcmp.eq.s32.totalorder %v2685_v27, %v2390_v44 }
  0x9b   : > { %v480_v21 = vsel %vm460_vm10, %v2353_v30, 0.0  ;;  %v481_v36 = vsel %vm461_vm11, %v2353_v30, 0.0  ;;  %vm525_vm12 = vcmp.eq.s32.totalorder %v2676_v62, %v2410_v19  ;;  %v2756_v41 = vadd.s32 104, %v2268_v4 }
  0x9c   : > { %v2753_v61 = vpack.c.bf16 %v778_v35, %v775_v47  ;;  %v496_v37 = vadd.f32 %v480_v21, %v432_v31  ;;  %v497_v39 = vadd.f32 %v481_v36, %v433_v11  ;;  %vm526_vm13 = vcmp.eq.s32.totalorder %v2685_v27, %v2410_v19 }
  0x9d   : > { %v545_v43 = vsel %vm525_vm12, %v2358_v34, 0.0  ;;  %vm586_vm15 = vcmp.eq.s32.totalorder %v2676_v62, %v2413_v20  ;;  %vm587_vm1 = vcmp.eq.s32.totalorder %v2685_v27, %v2413_v20  ;;  %v546_v46 = vsel %vm526_vm13, %v2358_v34, 0.0 }
  0x9e   : > { %1829 = vmatpush3.bf16.msra.mxu1 %v2753_v61  ;;  %1901 = vmatpush3.bf16.msra.mxu0 %v2753_v61  ;;  %v561_v51 = vadd.f32 %v545_v43, %v496_v37  ;;  %v606_v52 = vsel %vm586_vm15, %v2397_v58, 0.0  ;;  %v607_v15 = vsel %vm587_vm1, %v2397_v58, 0.0  ;;  %v562_v13 = vadd.f32 %v546_v46, %v497_v39 }
  0x9f   : > { %1830 = vmatprep.subr.bf16.mxu1 %v2150_v0  ;;  %1902 = vmatprep.subr.bf16.mxu0 %v2150_v0  ;;  %vm647_vm2 = vcmp.eq.s32.totalorder %v2676_v62, %v2450_v5  ;;  %vm648_vm3 = vcmp.eq.s32.totalorder %v2685_v27, %v2450_v5  ;;  %v2782_v32 = vadd.s32 112, %v2268_v4  ;;  %vm708_vm4 = vcmp.eq.s32.totalorder %v2676_v62, %v2473_v57 }
  0xa0   : > { %v622_v14 = vadd.f32 %v606_v52, %v561_v51  ;;  %v667_v17 = vsel %vm647_vm2, %v2419_v29, 0.0  ;;  %v668_v25 = vsel %vm648_vm3, %v2419_v29, 0.0  ;;  %v623_v33 = vadd.f32 %v607_v15, %v562_v13  ;;  %v2821_v51 = vld [vmem:[%s184_s1] sm:$0x3] }
  0xa1   : > { %vm709_vm5 = vcmp.eq.s32.totalorder %v2685_v27, %v2473_v57  ;;  %v728_v23 = vsel %vm708_vm4, %v2440_v42, 0.0  ;;  %vm265_vm6 = vcmp.eq.s32.totalorder %v2747_v59, %v2345_v22  ;;  %vm266_vm0 = vcmp.eq.s32.totalorder %v2756_v41, %v2345_v22 }
  0xa2   : > { %v683_v10 = vadd.f32 %v667_v17, %v622_v14  ;;  %v729_v56 = vsel %vm709_vm5, %v2440_v42, 0.0  ;;  %v285_v49 = vsel %vm265_vm6, %v2314_v53, 0.0  ;;  %v684_v50 = vadd.f32 %v668_v25, %v623_v33 }
  0xa3   : > { %v286_v62 = vsel %vm266_vm0, %v2314_v53, 0.0  ;;  %vm329_vm7 = vcmp.eq.s32.totalorder %v2747_v59, %v2348_v28  ;;  %vm330_vm8 = vcmp.eq.s32.totalorder %v2756_v41, %v2348_v28  ;;  %vm398_vm9 = vcmp.eq.s32.totalorder %v2747_v59, %v2376_v45 }
  0xa4   : > { %v2806_v27 = vadd.f32 %v728_v23, %v683_v10  ;;  %v349_v31 = vsel %vm329_vm7, %v2319_v60, 0.0  ;;  %v350_v11 = vsel %vm330_vm8, %v2319_v60, 0.0  ;;  %v2812_v21 = vadd.f32 %v729_v56, %v684_v50 }
  0xa5   : > { %v365_v36 = vadd.f32 %v349_v31, %v285_v49  ;;  %v366_v37 = vadd.f32 %v350_v11, %v286_v62  ;;  %vm399_vm10 = vcmp.eq.s32.totalorder %v2756_v41, %v2376_v45  ;;  %v418_v43 = vsel %vm398_vm9, %v2333_v12, 0.0 }
  0xa6   : > { %v781_v39 = vand.u32 4294901760, %v2806_v27  ;;  %v419_v46 = vsel %vm399_vm10, %v2333_v12, 0.0  ;;  %vm462_vm11 = vcmp.eq.s32.totalorder %v2747_v59, %v2390_v44  ;;  %v784_v52 = vand.u32 4294901760, %v2812_v21 }
  0xa7   : > { %v434_v15 = vadd.f32 %v418_v43, %v365_v36  ;;  %v435_v13 = vadd.f32 %v419_v46, %v366_v37  ;;  %vm463_vm12 = vcmp.eq.s32.totalorder %v2756_v41, %v2390_v44  ;;  %v482_v14 = vsel %vm462_vm11, %v2353_v30, 0.0 }
  0xa8   : > { %v483_v17 = vsel %vm463_vm12, %v2353_v30, 0.0  ;;  %vm527_vm13 = vcmp.eq.s32.totalorder %v2747_v59, %v2410_v19  ;;  %v2831_v25 = vadd.s32 120, %v2268_v4  ;;  %v2837_v33 = vpack.c.bf16 %v784_v52, %v781_v39 }
  0xa9   : > { %v498_v23 = vadd.f32 %v482_v14, %v434_v15  ;;  %v499_v10 = vadd.f32 %v483_v17, %v435_v13  ;;  %v2840_v56 = vand.u32 4294901760, %v2821_v51  ;;  %vm528_vm15 = vcmp.eq.s32.totalorder %v2756_v41, %v2410_v19 }
  0xaa   : > { %v547_v49 = vsel %vm527_vm13, %v2358_v34, 0.0  ;;  %vm588_vm1 = vcmp.eq.s32.totalorder %v2747_v59, %v2413_v20  ;;  %vm589_vm2 = vcmp.eq.s32.totalorder %v2756_v41, %v2413_v20  ;;  %1832 = vmatpush3.bf16.msra.mxu1 %v2837_v33  ;;  %1904 = vmatpush3.bf16.msra.mxu0 %v2837_v33  ;;  %v548_v4 = vsel %vm528_vm15, %v2358_v34, 0.0 }
  0xab   : > { %v563_v50 = vadd.f32 %v547_v49, %v498_v23  ;;  %v608_v62 = vsel %vm588_vm1, %v2397_v58, 0.0  ;;  %v609_v31 = vsel %vm589_vm2, %v2397_v58, 0.0  ;;  %1833 = vmatprep.subr.bf16.mxu1 %v2150_v0  ;;  %1905 = vmatprep.subr.bf16.mxu0 %v2150_v0  ;;  %v564_v11 = vadd.f32 %v548_v4, %v499_v10 }
  0xac   : > { %vm649_vm3 = vcmp.eq.s32.totalorder %v2747_v59, %v2450_v5  ;;  %vm650_vm4 = vcmp.eq.s32.totalorder %v2756_v41, %v2450_v5  ;;  %v844_v36 = vand.u32 4294901760, %v2501_v63  ;;  %vm710_vm5 = vcmp.eq.s32.totalorder %v2747_v59, %v2473_v57 }
  0xad   : > { %v624_v37 = vadd.f32 %v608_v62, %v563_v50  ;;  %v669_v43 = vsel %vm649_vm3, %v2419_v29, 0.0  ;;  %v670_v46 = vsel %vm650_vm4, %v2419_v29, 0.0  ;;  %v625_v15 = vadd.f32 %v609_v31, %v564_v11 }
  0xae   : > { %vm711_vm6 = vcmp.eq.s32.totalorder %v2756_v41, %v2473_v57  ;;  %v730_v13 = vsel %vm710_vm5, %v2440_v42, 0.0  ;;  %vm267_vm0 = vcmp.eq.s32.totalorder %v2782_v32, %v2345_v22  ;;  %vm268_vm7 = vcmp.eq.s32.totalorder %v2831_v25, %v2345_v22 }
  0xaf   : > { %v685_v14 = vadd.f32 %v669_v43, %v624_v37  ;;  %v731_v17 = vsel %vm711_vm6, %v2440_v42, 0.0  ;;  %v287_v23 = vsel %vm267_vm0, %v2314_v53, 0.0  ;;  %v686_v10 = vadd.f32 %v670_v46, %v625_v15 }
  0xb0   : > { %v288_v59 = vsel %vm268_vm7, %v2314_v53, 0.0  ;;  %vm331_vm8 = vcmp.eq.s32.totalorder %v2782_v32, %v2348_v28  ;;  %vm332_vm9 = vcmp.eq.s32.totalorder %v2831_v25, %v2348_v28  ;;  %vm400_vm10 = vcmp.eq.s32.totalorder %v2782_v32, %v2376_v45 }
  0xb1   : > { %v2879_v41 = vadd.f32 %v730_v13, %v685_v14  ;;  %v351_v49 = vsel %vm331_vm8, %v2319_v60, 0.0  ;;  %v352_v4 = vsel %vm332_vm9, %v2319_v60, 0.0  ;;  %v2885_v22 = vadd.f32 %v731_v17, %v686_v10 }
  0xb2   : > { %v367_v50 = vadd.f32 %v351_v49, %v287_v23  ;;  %v368_v62 = vadd.f32 %v352_v4, %v288_v59  ;;  %vm401_vm11 = vcmp.eq.s32.totalorder %v2831_v25, %v2376_v45  ;;  %v420_v28 = vsel %vm400_vm10, %v2333_v12, 0.0 }
  0xb3   : > { %v787_v53 = vand.u32 4294901760, %v2879_v41  ;;  %v421_v31 = vsel %vm401_vm11, %v2333_v12, 0.0  ;;  %vm464_vm12 = vcmp.eq.s32.totalorder %v2782_v32, %v2390_v44  ;;  %v790_v60 = vand.u32 4294901760, %v2885_v22 }
  0xb4   : > { %v436_v11 = vadd.f32 %v420_v28, %v367_v50  ;;  %v437_v37 = vadd.f32 %v421_v31, %v368_v62  ;;  %vm465_vm13 = vcmp.eq.s32.totalorder %v2831_v25, %v2390_v44  ;;  %v484_v43 = vsel %vm464_vm12, %v2353_v30, 0.0 }
  0xb5   : > { %v485_v45 = vsel %vm465_vm13, %v2353_v30, 0.0  ;;  %vm529_vm15 = vcmp.eq.s32.totalorder %v2782_v32, %v2410_v19  ;;  %v851_v46 = vand.u32 4294901760, %v2503_v38  ;;  %v2906_v12 = vpack.c.bf16 %v790_v60, %v787_v53 }
  0xb6   : > { %v500_v15 = vadd.f32 %v484_v43, %v436_v11  ;;  %v501_v13 = vadd.f32 %v485_v45, %v437_v37  ;;  %v858_v14 = vand.u32 4294901760, %v2547_v2  ;;  %vm530_vm1 = vcmp.eq.s32.totalorder %v2831_v25, %v2410_v19 }
  0xb7   : > { %v549_v30 = vsel %vm529_vm15, %v2358_v34, 0.0  ;;  %vm590_vm2 = vcmp.eq.s32.totalorder %v2782_v32, %v2413_v20  ;;  %vm591_vm3 = vcmp.eq.s32.totalorder %v2831_v25, %v2413_v20  ;;  %1835 = vmatpush3.bf16.msra.mxu1 %v2906_v12  ;;  %1907 = vmatpush3.bf16.msra.mxu0 %v2906_v12  ;;  %v550_v44 = vsel %vm530_vm1, %v2358_v34, 0.0 }
  0xb8   : > { %v565_v17 = vadd.f32 %v549_v30, %v500_v15  ;;  %v610_v23 = vsel %vm590_vm2, %v2397_v58, 0.0  ;;  %v611_v10 = vsel %vm591_vm3, %v2397_v58, 0.0  ;;  %1836 = vmatprep.subr.bf16.mxu1 %v2150_v0  ;;  %1908 = vmatprep.subr.bf16.mxu0 %v2150_v0  ;;  %v566_v19 = vadd.f32 %v550_v44, %v501_v13 }
  0xb9   : > { %vm651_vm4 = vcmp.eq.s32.totalorder %v2782_v32, %v2450_v5  ;;  %vm652_vm5 = vcmp.eq.s32.totalorder %v2831_v25, %v2450_v5  ;;  %v865_v20 = vand.u32 4294901760, %v2549_v3  ;;  %vm712_vm6 = vcmp.eq.s32.totalorder %v2782_v32, %v2473_v57 }
  0xba   : > { %v626_v59 = vadd.f32 %v610_v23, %v565_v17  ;;  %v671_v34 = vsel %vm651_vm4, %v2419_v29, 0.0  ;;  %v672_v49 = vsel %vm652_vm5, %v2419_v29, 0.0  ;;  %v627_v58 = vadd.f32 %v611_v10, %v566_v19 }
  0xbb   : > { %vm713_vm0 = vcmp.eq.s32.totalorder %v2831_v25, %v2473_v57  ;;  %v732_v4 = vsel %vm712_vm6, %v2440_v42, 0.0  ;;  %v2937_v50 = vsub.f32 %v2821_v51, %v2840_v56  ;;  %v845_v29 = vsub.f32 %v2501_v63, %v844_v36 }
  0xbc   : > { %v687_v5 = vadd.f32 %v671_v34, %v626_v59  ;;  %v733_v62 = vsel %vm713_vm0, %v2440_v42, 0.0  ;;  %v852_v28 = vsub.f32 %v2503_v38, %v851_v46  ;;  %v688_v32 = vadd.f32 %v672_v49, %v627_v58 }
  0xbd   : > { %v833_v31 = vand.u32 4294901760, %v2937_v50  ;;  %v1912_v57 = vpack.c.bf16 %v851_v46, %v844_v36  ;;  %v859_v25 = vsub.f32 %v2547_v2, %v858_v14  ;;  %v846_v51 = vand.u32 4294901760, %v845_v29 }
  0xbe   : > { %v748_v11 = vadd.f32 %v732_v4, %v687_v5  ;;  %v853_v37 = vand.u32 4294901760, %v852_v28  ;;  %v866_v43 = vsub.f32 %v2549_v3, %v865_v20  ;;  %v749_v42 = vadd.f32 %v733_v62, %v688_v32 }
  0xbf   : > { %v834_v45 = vsub.f32 %v2937_v50, %v833_v31  ;;  %v860_v15 = vand.u32 4294901760, %v859_v25  ;;  %v1915_v13 = vpack.c.bf16 %v865_v20, %v858_v14  ;;  %v872_v23 = vand.u32 4294901760, %v2613_v16 }
  0xc0   : > { %v793_v30 = vand.u32 4294901760, %v748_v11  ;;  %v1840_v44 = vpack.c.bf16 %v853_v37, %v846_v51  ;;  %v867_v17 = vand.u32 4294901760, %v866_v43  ;;  %v2954_v36 = vsub.f32 %v2653_v18, %v769_v55 }
  0xc1   : > { %v2959_v46 = vsub.f32 %v2659_v54, %v772_v48  ;;  %v796_v10 = vand.u32 4294901760, %v749_v42  ;;  %v879_v19 = vand.u32 4294901760, %v2615_v7  ;;  %v873_v14 = vsub.f32 %v2613_v16, %v872_v23 }
  0xc2   : > { %v1843_v59 = vpack.c.bf16 %v867_v17, %v860_v15  ;;  %v2969_v18 = vsub.f32 %v2723_v26, %v775_v47  ;;  %v835_v55 = vand.u32 4294901760, %v834_v45  ;;  %v2974_v54 = vsub.f32 %v2729_v9, %v778_v35 }
  0xc3   : > { %v2963_v20 = vpack.c.bf16 %v796_v10, %v793_v30  ;;  %v880_v34 = vsub.f32 %v2615_v7, %v879_v19  ;;  %v1918_v49 = vpack.c.bf16 %v879_v19, %v872_v23  ;;  %v874_v58 = vand.u32 4294901760, %v873_v14 }
  0xc4   : > { %v886_v4 = vand.u32 4294901760, %v2954_v36  ;;  %v893_v5 = vand.u32 4294901760, %v2959_v46  ;;  %v2985_v47 = vsub.f32 %v2806_v27, %v781_v39  ;;  %v2990_v9 = vsub.f32 %v2812_v21, %v784_v52 }
  0xc5   : > { %1838 = vmatpush3.bf16.msra.mxu1 %v2963_v20  ;;  %1910 = vmatpush3.bf16.msra.mxu0 %v2963_v20  ;;  %v881_v48 = vand.u32 4294901760, %v880_v34  ;;  %v900_v29 = vand.u32 4294901760, %v2969_v18  ;;  %v907_v28 = vand.u32 4294901760, %v2974_v54  ;;  %v3001_v27 = vsub.f32 %v2879_v41, %v787_v53 }
  0xc6   : > { %1839 = vmatprep.subr.bf16.mxu1 %v2150_v0  ;;  %1911 = vmatprep.subr.bf16.mxu0 %v2150_v0  ;;  %v887_v35 = vsub.f32 %v2954_v36, %v886_v4  ;;  %v894_v62 = vsub.f32 %v2959_v46, %v893_v5  ;;  %v3006_v21 = vsub.f32 %v2885_v22, %v790_v60  ;;  %v914_v39 = vand.u32 4294901760, %v2985_v47 }
  0xc7   : > { %v1846_v26 = vpack.c.bf16 %v881_v48, %v874_v58  ;;  %v921_v52 = vand.u32 4294901760, %v2990_v9  ;;  %v1864_v32 = vpack.c.bf16 %v2503_v38, %v2501_v63  ;;  %v1867_v41 = vpack.c.bf16 %v2549_v3, %v2547_v2 }
  0xc8   : > { %1638 = vmatmul.mubr.f32.vlgmr.msra.gmra.mrb[0].mxu1 %v835_v55  ;;  %1743 = vmatmul.mubr.f32.vlgmr.msra.gmra.mrb[0].mxu0 %v833_v31  ;;  %v888_v22 = vand.u32 4294901760, %v887_v35  ;;  %v895_v53 = vand.u32 4294901760, %v894_v62  ;;  %v901_v60 = vsub.f32 %v2969_v18, %v900_v29  ;;  %v908_v31 = vsub.f32 %v2974_v54, %v907_v28 }
  0xc9   : > { %1841 = vmatpush3.bf16.msra.mxu1 %v1840_v44  ;;  %1913 = vmatpush3.bf16.msra.mxu0 %v1912_v57  ;;  %v1870_v57 = vpack.c.bf16 %v2615_v7, %v2613_v16  ;;  %v3024_v25 = vsub.f32 %v748_v11, %v793_v30  ;;  %v3026_v51 = vsub.f32 %v749_v42, %v796_v10  ;;  %v928_v15 = vand.u32 4294901760, %v3001_v27 }
  0xca   : > { %1842 = vmatprep.subr.bf16.mxu1 %v2150_v0  ;;  %1914 = vmatprep.subr.bf16.mxu0 %v2150_v0  ;;  %v1921_v37 = vpack.c.bf16 %v893_v5, %v886_v4  ;;  %v915_v43 = vsub.f32 %v2985_v47, %v914_v39  ;;  %v922_v45 = vsub.f32 %v2990_v9, %v921_v52  ;;  %v902_v44 = vand.u32 4294901760, %v901_v60 }
  0xcb   : > { %1672 = vmatprep.mubr.msk.f32.mxu1 %vm2151_vm14, %v2152_v40  ;;  %1777 = vmatprep.mubr.msk.f32.mxu0 %vm2151_vm14, %v2152_v40  ;;  %v909_v17 = vand.u32 4294901760, %v908_v31  ;;  %v935_v23 = vand.u32 4294901760, %v3006_v21  ;;  %v1924_v11 = vpack.c.bf16 %v907_v28, %v900_v29  ;;  %v929_v10 = vsub.f32 %v3001_v27, %v928_v15 }
  0xcc   : > { %v916_v42 = vand.u32 4294901760, %v915_v43  ;;  %v923_v30 = vand.u32 4294901760, %v922_v45  ;;  %v942_v14 = vand.u32 4294901760, %v3024_v25  ;;  %v949_v34 = vand.u32 4294901760, %v3026_v51 }
  0xcd   : > { %1844 = vmatpush3.bf16.msra.mxu1 %v1843_v59  ;;  %1916 = vmatpush3.bf16.msra.mxu0 %v1915_v13  ;;  %v1849_v13 = vpack.c.bf16 %v895_v53, %v888_v22  ;;  %v1852_v19 = vpack.c.bf16 %v909_v17, %v902_v44  ;;  %v936_v59 = vsub.f32 %v3006_v21, %v935_v23  ;;  %v930_v55 = vand.u32 4294901760, %v929_v10 }
  0xce   : > { %1845 = vmatprep.subr.bf16.mxu1 %v2150_v0  ;;  %1917 = vmatprep.subr.bf16.mxu0 %v2150_v0  ;;  %v1855_v58 = vpack.c.bf16 %v923_v30, %v916_v42  ;;  %v943_v4 = vsub.f32 %v3024_v25, %v942_v14  ;;  %v950_v5 = vsub.f32 %v3026_v51, %v949_v34 }
  0xcf   : > { %v937_v48 = vand.u32 4294901760, %v936_v59  ;;  %v1930_v35 = vpack.c.bf16 %v935_v23, %v928_v15  ;;  %v1876_v63 = vpack.c.bf16 %v2974_v54, %v2969_v18  ;;  %v1879_v38 = vpack.c.bf16 %v2990_v9, %v2985_v47 }
  0xd0   : > { %v944_v62 = vand.u32 4294901760, %v943_v4  ;;  %v951_v29 = vand.u32 4294901760, %v950_v5  ;;  %v1885_v2 = vpack.c.bf16 %v3026_v51, %v3024_v25 }
  0xd1   : > { %1847 = vmatpush3.bf16.msra.mxu1 %v1846_v26  ;;  %1919 = vmatpush3.bf16.msra.mxu0 %v1918_v49  ;;  %v1927_v49 = vpack.c.bf16 %v921_v52, %v914_v39  ;;  %v1858_v26 = vpack.c.bf16 %v937_v48, %v930_v55  ;;  %v1933_v39 = vpack.c.bf16 %v949_v34, %v942_v14 }
  0xd2   : > { %1848 = vmatprep.subr.bf16.mxu1 %v2150_v0  ;;  %1920 = vmatprep.subr.bf16.mxu0 %v2150_v0  ;;  %v1861_v28 = vpack.c.bf16 %v951_v29, %v944_v62 }
  0xd5   : > { %1850 = vmatpush3.bf16.msra.mxu1 %v1849_v13  ;;  %1922 = vmatpush3.bf16.msra.mxu0 %v1921_v37 }
  0xd6   : > { %1851 = vmatprep.subr.bf16.mxu1 %v2150_v0  ;;  %1923 = vmatprep.subr.bf16.mxu0 %v2150_v0 }
  0xd9   : > { %1853 = vmatpush3.bf16.msra.mxu1 %v1852_v19  ;;  %1925 = vmatpush3.bf16.msra.mxu0 %v1924_v11 }
  0xda   : > { %1854 = vmatprep.subr.bf16.mxu1 %v2150_v0  ;;  %1926 = vmatprep.subr.bf16.mxu0 %v2150_v0 }
  0xdd   : > { %1856 = vmatpush3.bf16.msra.mxu1 %v1855_v58  ;;  %1928 = vmatpush3.bf16.msra.mxu0 %v1927_v49 }
  0xde   : > { %1857 = vmatprep.subr.bf16.mxu1 %v2150_v0  ;;  %1929 = vmatprep.subr.bf16.mxu0 %v2150_v0 }
  0xe1   : > { %1859 = vmatpush3.bf16.msra.mxu1 %v1858_v26  ;;  %1931 = vmatpush3.bf16.msra.mxu0 %v1930_v35 }
  0xe2   : > { %1860 = vmatprep.subr.bf16.mxu1 %v2150_v0  ;;  %1932 = vmatprep.subr.bf16.mxu0 %v2150_v0 }
  0xe5   : > { %1862 = vmatpush3.bf16.msra.mxu1 %v1861_v28  ;;  %1934 = vmatpush3.bf16.msra.mxu0 %v1933_v39 }
  0xe6   : > { %1863 = vmatprep.subr.bf16.mxu1 %v2150_v0  ;;  %1935 = vmatprep.subr.bf16.mxu0 %v2150_v0 }
  0xe8   : > { %1673 = vmatmul.mubr.f32.vlgmr.msra.gmra.mrb[0].mxu1 %v2840_v56  ;;  %1778 = vmatmul.mubr.f32.vlgmr.msra.gmra.mrb[0].mxu0 %v2840_v56 }
  0xe9   : > { %1865 = vmatpush3.bf16.msra.mxu1 %v1864_v32  ;;  %1937 = vmatpush3.bf16.msra.mxu0 %v2499_v24  ;;  %v1873_v24 = vpack.c.bf16 %v2959_v46, %v2954_v36 }
  0xea   : > { %1866 = vmatprep.subr.bf16.mxu1 %v2150_v0  ;;  %1938 = vmatprep.subr.bf16.mxu0 %v2150_v0 }
  0xeb   : > { %1707 = vmatprep.mubr.msk.f32.mxu1 %vm2151_vm14, %v2152_v40  ;;  %1812 = vmatprep.mubr.msk.f32.mxu0 %vm2151_vm14, %v2152_v40 }
  0xed   : > { %1868 = vmatpush3.bf16.msra.mxu1 %v1867_v41  ;;  %1940 = vmatpush3.bf16.msra.mxu0 %v2545_v8  ;;  %v1882_v8 = vpack.c.bf16 %v3006_v21, %v3001_v27 }
  0xee   : > { %1869 = vmatprep.subr.bf16.mxu1 %v2150_v0  ;;  %1941 = vmatprep.subr.bf16.mxu0 %v2150_v0 }
  0xf1   : > { %1871 = vmatpush3.bf16.msra.mxu1 %v1870_v57  ;;  %1943 = vmatpush3.bf16.msra.mxu0 %v2611_v6 }
  0xf2   : > { %1872 = vmatprep.subr.bf16.mxu1 %v2150_v0  ;;  %1944 = vmatprep.subr.bf16.mxu0 %v2150_v0 }
  0xf5   : > { %1874 = vmatpush3.bf16.msra.mxu1 %v1873_v24  ;;  %1946 = vmatpush3.bf16.msra.mxu0 %v2682_v1 }
  0xf6   : > { %1875 = vmatprep.subr.bf16.mxu1 %v2150_v0  ;;  %1947 = vmatprep.subr.bf16.mxu0 %v2150_v0 }
  0xf9   : > { %1877 = vmatpush3.bf16.msra.mxu1 %v1876_v63  ;;  %1949 = vmatpush3.bf16.msra.mxu0 %v2753_v61 }
  0xfa   : > { %1878 = vmatprep.subr.bf16.mxu1 %v2150_v0  ;;  %1950 = vmatprep.subr.bf16.mxu0 %v2150_v0 }
  0xfd   : > { %1880 = vmatpush3.bf16.msra.mxu1 %v1879_v38  ;;  %1952 = vmatpush3.bf16.msra.mxu0 %v2837_v33 }
  0xfe   : > { %1881 = vmatprep.subr.bf16.mxu1 %v2150_v0  ;;  %1953 = vmatprep.subr.bf16.mxu0 %v2150_v0 }
 0x101   : > { %1883 = vmatpush3.bf16.msra.mxu1 %v1882_v8  ;;  %1955 = vmatpush3.bf16.msra.mxu0 %v2906_v12 }
 0x102   : > { %1884 = vmatprep.subr.bf16.mxu1 %v2150_v0  ;;  %1956 = vmatprep.subr.bf16.mxu0 %v2150_v0 }
 0x105   : > { %1886 = vmatpush3.bf16.msra.mxu1 %v1885_v2  ;;  %1958 = vmatpush3.bf16.msra.mxu0 %v2963_v20 }
 0x108   : > { %1708 = vmatmul.mubr.f32.vlgmr.msra.gmra.mrb[0].mxu1 %v2937_v50  ;;  %1813 = vmatmul.mubr.f32.vlgmr.msra.gmra.mrb[0].mxu0 %v2840_v56 }
 0x1db   : > { %v1092_v3 = vpop.f32.mrb[0].mxu1  ;;  %v1387_v40 = vpop.f32.mrb[0].mxu0 }
 0x1dc   : > { %v1959_v6 = vadd.f32 %v1387_v40, %v1092_v3  ;;  %v1709_v16 = vpop.f32.mrb[1].mxu1  ;;  %v1814_v7 = vpop.f32.mrb[1].mxu0 }
 0x1de   : > { %1391 = vst [vmem:[%s176_s21] sm:$0x3] %v1959_v6 }
 0x1df   : > { %2078 = shalt.err (!%p2075_p5)
}
 0x1e0   : > { %s2079_s7 = scalar_lea.hbm %s3104_s27, 32  ;;  %s2083_s10 = scalar_lea.hbm %s3154_s5, 128 }
 0x1e1   : > { %p2080_p6 = scmp.ne.s32.totalorder %s3104_s27, %s2079_s7  ;;  %p2084_p10 = scmp.lt.u32.totalorder %s3104_s27, %s3154_s5 }
 0x1e2   : > { %p2085_p11 = scmp.lt.u32.totalorder %s2083_s10, %s2079_s7  ;;  %p2087_p13 = scmp.lt.u32.totalorder %s2079_s7, %s3104_s27 }
 0x1e3   : > { %p2081_p8 = pnand %p2080_p6, %p2242_p3 }
 0x1e4   : > { %p2086_p12 = por %p2085_p11, %p2084_p10 }
 0x1e5   : > { %p2082_p9 = pneg %p2081_p8 }
 0x1e6   : > { %p2088_p0 = por %p2087_p13, %p2086_p12 }
 0x1e8   : > { %p2089_p1 = pnand %p2088_p0, %p2082_p9 }
 0x1ea   : > { %2092 = shalt.err (!%p2089_p1)
}
 0x1eb   : > { %1970 = dma.vmem_to_hbm [thread:$0]  (%p2242_p3), %s3106_s24, 32, %s3104_s27, %s1393_s28  }
 0x1ec PF: > { %p1976_p2 = scmp.ge.s32.totalorder %s2145_s15, 2  ;;  %s1419_s16 = sand.u32 1, %s2125_s2  }
 0x1ed   : > { %s1420_s17 = scalar_lea.sflag [#allocation7], %s1419_s16 }
 0x1ee   : > { %p1973_p4 = pnand %p1976_p2, %p2249_p7 }
 0x1f0   : > { %2120 = dma.done.wait (!%p1973_p4), %s1420_s17, 32  }
 0x1f1   : > { %2122 = vsyncadd (!%p1973_p4), %s1420_s17, 4294967264  ;;  %s30_s15 = sadd.s32 1, %s2145_s15   ;;  %s3161_s2 = smov %s2129_s11 }
 0x1f2   : > { %p27_p5 = scmp.ge.s32.totalorder %s30_s15, 6   ;;  %s3162_s11 = smov %s2133_s12 }
 0x1f3   : > { %s3163_s12 = smov %s2255_s23  ;;  %s3164_s13 = smov %s2141_s14 }
 0x1f4   : > { %s3165_s14 = smov %s3167_s18  ;;  %29 = sbr.rel (!%p27_p5) target bundleno = 37 (0x25), region = 66 }
 0x1fb   :  { %1425 = vsyncpa [#allocation7], 1 }
 0x1fc   :  { %1427 = vsyncpa [#allocation7 + $0x1], 1 }

</bundles_post_ra>
